<compile_context>
chip_gen: v5e
topology: v5e:2x2
jax: 0.10.0
libtpu: 0.0.40
codegen_flags: <defaults>
</compile_context>

<pallas_src>
import numpy as np
import jax
import jax.numpy as jnp
from jax import lax
from jax.experimental import pallas as pl
from jax.experimental.pallas import tpu as pltpu

# ---- module config (mirrors MLSTM.__init__) ----
EMBED_DIM = 24
MASK_DIM = 8
INPUT_DIM = EMBED_DIM + MASK_DIM        # 32
L_HIDDEN_SIZE = 32                      # bidirectional output width
HIDDEN = L_HIDDEN_SIZE // 2             # per-direction hidden size = 16
L_NUM_LAYERS = 2                        # -> int(2/2) = 1 LSTM layer


def _mlstm_kernel(lens_ref, x_ref, wih_ref, whh_ref, b_ref, out_ref, gx_ref):
    """Fused bidirectional LSTM recurrence.

    Layouts (per-step work = one [B,2H] x [2H,8H] bf16 matmul + one tanh vreg):
      lens_ref: [B, 1]   int32   packed-sequence lengths (0 for padded rows)
      x_ref   : [T*B, 2D] bf16   direction-merged rows: row block s holds
                                 [x at t=s | x at t=T-1-s]
      wih_ref : [2D, 8H] bf16    block-diagonal, gate-major cols
                                 [i_f i_b f_f f_b g_f g_b o_f o_b]
                                 (i/f/o columns pre-scaled by 0.5)
      whh_ref : [2H, 8H] bf16    rows 0:H feed fwd cols only, rows H:2H bwd
                                 cols only (i/f/o columns pre-scaled by 0.5)
      b_ref   : [1, 8H]  f32     b_ih + b_hh folded, same layout/scaling
      out_ref : [T*B, 2H] f32    lanes 0:H fwd hidden, lanes H:2H bwd hidden
      gx_ref  : [T*B, 8H] f32    VMEM scratch: hoisted, direction-merged input
                                 projection (+ bias)
    """
    TB, _ = gx_ref.shape
    H2 = whh_ref.shape[0]                 # 2H (combined fwd+bwd state width)
    H = H2 // 2
    B = lens_ref.shape[0]
    T = TB // B

    # ---- hoisted input projection: both directions, all timesteps, + bias ----
    # Because x_ref is direction-merged and wih_ref is block-diagonal, row
    # block s of the result already holds [fwd gate bands from t=s | bwd gate
    # bands from t=T-1-s], so the recurrence needs no per-step select.
    gx_ref[...] = (jnp.dot(x_ref[...], wih_ref[...],
                           preferred_element_type=jnp.float32) + b_ref[...])

    lens = lens_ref[...]                                   # [B, 1] int32
    whh = whh_ref[...]                                     # [2H, 8H] bf16

    lane_s = lax.broadcasted_iota(jnp.int32, (B, H2), 1)
    fwd_half = lane_s < H                                  # fwd half of [B, 2H] state

    h0 = jnp.zeros((B, H2), jnp.float32)                   # [h_f | h_b]
    c0 = jnp.zeros((B, H2), jnp.float32)                   # [c_f | c_b]

    # TODO(synk): optionally latch whh in the MXU across steps via
    # pltpu.matmul_push_rhs / matmul_acc_lhs / matmul_pop; deferred pending a
    # pl.lower_as_mlir check that the default codegen doesn't already hoist
    # the RHS push out of the unrolled chain.

    def body(s, carry):
        h, c = carry
        tb = T - 1 - s                                     # backward-direction timestep
        gx = gx_ref[pl.ds(s * B, B), :]                    # [B, 8H], single load
        # single bf16 recurrent matmul for both directions (whh block-structured)
        gates = gx + jnp.dot(h.astype(jnp.bfloat16), whh,
                             preferred_element_type=jnp.float32)
        # ONE EUP push: i/f/o columns were pre-scaled by 0.5 host-side, so
        # sigmoid(z) = 0.5*tanh(z/2) + 0.5 = 0.5*u + 0.5; g band of u is direct.
        u = jnp.tanh(gates)                                # [B, 8H]
        i = 0.5 * u[:, 0:H2] + 0.5
        f = 0.5 * u[:, H2:2 * H2] + 0.5
        g = u[:, 2 * H2:3 * H2]
        o = 0.5 * u[:, 3 * H2:4 * H2] + 0.5
        c_new = f * c + i * g
        h_new = o * jnp.tanh(c_new)                        # second (last) EUP push

        m_f = s < lens                                     # [B, 1] fwd time mask
        m_b = tb < lens                                    # [B, 1] bwd time mask
        # zero-padded outputs past each sequence's length (pad_packed_sequence)
        out_ref[pl.ds(s * B, B), 0:H] = jnp.where(m_f, h_new[:, 0:H], 0.0)
        out_ref[pl.ds(tb * B, B), H:H2] = jnp.where(m_b, h_new[:, H:H2], 0.0)

        # Only the backward chain needs freezing: its state must stay zero
        # until tb < len (chain starts at t = len-1).  The fwd chain past len
        # only feeds outputs that are already zero-masked, so it runs free.
        m_state = jnp.logical_or(fwd_half, m_b)            # [B, 2H]
        h = jnp.where(m_state, h_new, h)
        c = jnp.where(m_state, c_new, c)
        return h, c

    # Small T: full unroll gives the scheduler cross-iteration visibility to
    # overlap stores/selects of step s with the matmul of s+1.  Larger T
    # buckets: partial unroll to keep vreg live ranges under the 64-vreg limit.
    unroll = True if T <= 16 else 8
    lax.fori_loop(0, T, body, (h0, c0), unroll=unroll)


def _gate_interleave(wf, wb, h=HIDDEN):
    """[*, 4H] fwd + [*, 4H] bwd -> [*, 8H] cols [i_f i_b f_f f_b g_f g_b o_f o_b]."""
    cols = []
    for k in range(4):
        cols.append(wf[:, k * h:(k + 1) * h])
        cols.append(wb[:, k * h:(k + 1) * h])
    return jnp.concatenate(cols, axis=1)


def _ifo_half_scale(h=HIDDEN):
    """[1, 8H] column scale: 0.5 on i/f/o bands, 1.0 on g bands (sigmoid-via-tanh)."""
    s = np.ones((1, 8 * h), np.float32)
    s[:, 0:4 * h] = 0.5        # i and f bands
    s[:, 6 * h:8 * h] = 0.5    # o bands
    return jnp.asarray(s)


def mlstm_forward(feats, seq_lengths, params):
    """feats: [B, T, D_in] float32 (batch_first); seq_lengths: host ints [B], sorted desc."""
    B, T_feats, d_in = feats.shape
    H = HIDDEN
    lens_np = np.asarray(seq_lengths, dtype=np.int32)
    T_out = int(lens_np.max())                 # pad_packed_sequence output length

    # Bucket T to a multiple of 8 so recompiles are capped (T is baked into the
    # trace); length masks zero the padded tail.
    T = max(8, -(-T_out // 8) * 8)
    # Pad batch to a multiple of 8 so [B,128] gate/state vregs fill all sublanes;
    # padded rows get length 0 and therefore all-zero (masked) outputs.
    B_pad = max(8, -(-B // 8) * 8)

    T_data = min(T, T_feats)
    x = jnp.zeros((B_pad, T, d_in), jnp.float32)
    x = x.at[:B, :T_data, :].set(feats[:, :T_data, :])

    # Direction-merged, time-major input: row block s holds
    # [x at time s | x at time T-1-s]; cast to bf16 for the MXU.
    x_tm = jnp.transpose(x, (1, 0, 2))                       # [T, B_pad, D]
    x_fwd = x_tm.reshape(T * B_pad, d_in)
    x_bwd = x_tm[::-1].reshape(T * B_pad, d_in)
    x_merged = jnp.concatenate([x_fwd, x_bwd], axis=1).astype(jnp.bfloat16)

    lens_pad = np.zeros((B_pad,), np.int32)
    lens_pad[:B] = lens_np
    lens = jnp.asarray(lens_pad).reshape(B_pad, 1)

    # Combined gate-major weights (built once on host): block-diagonal W_ih over
    # the merged input, block-structured W_hh over the [h_f|h_b] state, i/f/o
    # columns pre-scaled by 0.5 (sigmoid-via-tanh), MXU operands in bf16.
    scale = _ifo_half_scale()
    zi = jnp.zeros_like(params["wih_f"])
    zh = jnp.zeros_like(params["whh_f"])
    wih_blk = jnp.concatenate(
        [_gate_interleave(params["wih_f"], zi) * scale,      # rows 0:D  -> fwd cols
         _gate_interleave(zi, params["wih_b"]) * scale],     # rows D:2D -> bwd cols
        axis=0).astype(jnp.bfloat16)                         # [2D, 8H]
    whh = (jnp.concatenate(
        [_gate_interleave(params["whh_f"], zh),
         _gate_interleave(zh, params["whh_b"])], axis=0) * scale
           ).astype(jnp.bfloat16)                            # [2H, 8H]
    bias = (_gate_interleave(params["b_f"], params["b_b"]) * scale)   # [1, 8H] f32

    vspec = pl.BlockSpec(memory_space=pltpu.MemorySpace.VMEM)
    out_flat = pl.pallas_call(
        _mlstm_kernel,
        out_shape=jax.ShapeDtypeStruct((T * B_pad, 2 * H), jnp.float32),
        in_specs=[vspec] * 5,
        out_specs=vspec,
        scratch_shapes=[pltpu.VMEM((T * B_pad, 8 * H), jnp.float32)],
    )(lens, x_merged, wih_blk, whh, bias)
    # TODO(synk): for much larger B on v7x, add a "parallel" batch-chunk grid
    # axis (second TensorCore) and size the gx scratch per chunk for the 64 MiB
    # VMEM budget; harmful on single-TC v5e/v6e at this size, so omitted.

    out = out_flat.reshape(T, B_pad, 2 * H)
    out = jnp.transpose(out, (1, 0, 2))[:B, :T_out, :]
    return out                                  # [B, max(len), l_hidden_size]


def _orthogonal(key, shape):
    # deterministic orthogonal-style init (init-fidelity only: PyTorch's
    # init.orthogonal_ orthogonalizes the full [4H, in] matrix; close enough).
    n = max(shape)
    a = jax.random.normal(key, (n, n), jnp.float32)
    q, _ = jnp.linalg.qr(a)
    return q[:shape[0], :shape[1]].astype(jnp.float32)


def init_params(key):
    keys = jax.random.split(key, 8)
    h4 = 4 * HIDDEN
    scale = 1.0 / np.sqrt(HIDDEN)      # PyTorch default LSTM bias init range
    uni = lambda k: jax.random.uniform(k, (1, h4), jnp.float32, -scale, scale)
    return {
        # stored transposed relative to PyTorch ([in, 4H] / [H, 4H]), gate order i,f,g,o
        "wih_f": _orthogonal(keys[0], (INPUT_DIM, h4)),
        "whh_f": _orthogonal(keys[1], (HIDDEN, h4)),
        "b_f":   uni(keys[2]) + uni(keys[3]),          # b_ih + b_hh folded
        "wih_b": _orthogonal(keys[4], (INPUT_DIM, h4)),
        "whh_b": _orthogonal(keys[5], (HIDDEN, h4)),
        "b_b":   uni(keys[6]) + uni(keys[7]),
    }


if __name__ == "__main__":
    key = jax.random.PRNGKey(0)
    k_params, k_feats = jax.random.split(key)
    params = init_params(k_params)

    B, T = 2, 8
    feats = jax.random.normal(k_feats, (B, T, INPUT_DIM), jnp.float32)
    seq_lengths = np.array([8, 5], dtype=np.int32)     # sorted descending

    out = mlstm_forward(feats, seq_lengths, params)
    jax.block_until_ready(out)
    assert out.shape == (B, T, L_HIDDEN_SIZE), out.shape
    print("KERNEL_OK")
</pallas_src>

<mosaic_0001>
module attributes {stable_mosaic.version = 11 : i64} {
  func.func @_mlstm_kernel(%arg0: memref<8x1xi32, #tpu.memory_space<vmem>>, %arg1: memref<64x64xbf16, #tpu.memory_space<vmem>>, %arg2: memref<64x128xbf16, #tpu.memory_space<vmem>>, %arg3: memref<32x128xbf16, #tpu.memory_space<vmem>>, %arg4: memref<1x128xf32, #tpu.memory_space<vmem>>, %arg5: memref<64x32xf32, #tpu.memory_space<vmem>>, %arg6: memref<64x128xf32, #tpu.memory_space<vmem>>) attributes {dimension_semantics = [], scalar_prefetch = 0 : i64, scratch_operands = 1 : i64, tpu.core_type = #tpu.core_type<tc>} {
    %c0 = arith.constant 0 : index
    %c0_0 = arith.constant 0 : index
    %0 = vector.load %arg1[%c0, %c0_0] : memref<64x64xbf16, #tpu.memory_space<vmem>>, vector<64x64xbf16>
    %c0_1 = arith.constant 0 : index
    %c0_2 = arith.constant 0 : index
    %1 = vector.load %arg2[%c0_1, %c0_2] : memref<64x128xbf16, #tpu.memory_space<vmem>>, vector<64x128xbf16>
    %cst = arith.constant dense<0.000000e+00> : vector<64x128xf32>
    %2 = tpu.matmul %0, %1, %cst {dimension_numbers = #tpu.dot_dimension_numbers<[1], [0], [0], [1], [0, 0, 1, 1], [], []>} : vector<64x64xbf16>, vector<64x128xbf16>, vector<64x128xf32> -> vector<64x128xf32>
    %c0_3 = arith.constant 0 : index
    %c0_4 = arith.constant 0 : index
    %3 = vector.load %arg4[%c0_3, %c0_4] : memref<1x128xf32, #tpu.memory_space<vmem>>, vector<1x128xf32>
    %4 = vector.broadcast %3 : vector<1x128xf32> to vector<64x128xf32>
    %5 = arith.addf %2, %4 : vector<64x128xf32>
    %c0_5 = arith.constant 0 : index
    %c0_6 = arith.constant 0 : index
    %6 = vector.load %arg6[%c0_5, %c0_6] : memref<64x128xf32, #tpu.memory_space<vmem>>, vector<64x128xf32>
    tpu.vector_store %arg6[%c0_5, %c0_6], %5 {strides = array<i32>} : memref<64x128xf32, #tpu.memory_space<vmem>>, vector<64x128xf32>,
    %c0_7 = arith.constant 0 : index
    %c0_8 = arith.constant 0 : index
    %7 = vector.load %arg0[%c0_7, %c0_8] : memref<8x1xi32, #tpu.memory_space<vmem>>, vector<8x1xi32>
    %c0_9 = arith.constant 0 : index
    %c0_10 = arith.constant 0 : index
    %8 = vector.load %arg3[%c0_9, %c0_10] : memref<32x128xbf16, #tpu.memory_space<vmem>>, vector<32x128xbf16>
    %9 = tpu.iota {dimensions = array<i32: 1>} : vector<8x32xi32>
    %c16_i32 = arith.constant 16 : i32
    %10 = vector.broadcast %c16_i32 : i32 to vector<8x32xi32>
    %11 = arith.cmpi slt, %9, %10 : vector<8x32xi32>
    %cst_11 = arith.constant 0.000000e+00 : f32
    %12 = vector.broadcast %cst_11 : f32 to vector<8x32xf32>
    %cst_12 = arith.constant 0.000000e+00 : f32
    %13 = vector.broadcast %cst_12 : f32 to vector<8x32xf32>
    %c0_i32 = arith.constant 0 : i32
    %c7_i32 = arith.constant 7 : i32
    %14 = arith.subi %c7_i32, %c0_i32 : i32
    %c8_i32 = arith.constant 8 : i32
    %15 = arith.muli %c0_i32, %c8_i32 : i32
    %16 = arith.index_cast %15 : i32 to index
    %c0_13 = arith.constant 0 : index
    %17 = vector.load %arg6[%16, %c0_13] : memref<64x128xf32, #tpu.memory_space<vmem>>, vector<8x128xf32>
    %18 = arith.truncf %12 : vector<8x32xf32> to vector<8x32xbf16>
    %cst_14 = arith.constant dense<0.000000e+00> : vector<8x128xf32>
    %19 = tpu.matmul %18, %8, %cst_14 {dimension_numbers = #tpu.dot_dimension_numbers<[1], [0], [0], [1], [0, 0, 1, 1], [], []>} : vector<8x32xbf16>, vector<32x128xbf16>, vector<8x128xf32> -> vector<8x128xf32>
    %20 = arith.addf %17, %19 : vector<8x128xf32>
    %21 = math.tanh %20 : vector<8x128xf32>
    %22 = vector.extract_strided_slice %21 {offsets = [0, 0], sizes = [8, 32], strides = [1, 1]} : vector<8x128xf32> to vector<8x32xf32>
    %cst_15 = arith.constant 5.000000e-01 : f32
    %23 = vector.broadcast %cst_15 : f32 to vector<8x32xf32>
    %24 = arith.mulf %23, %22 : vector<8x32xf32>
    %cst_16 = arith.constant 5.000000e-01 : f32
    %25 = vector.broadcast %cst_16 : f32 to vector<8x32xf32>
    %26 = arith.addf %24, %25 : vector<8x32xf32>
    %27 = vector.extract_strided_slice %21 {offsets = [0, 32], sizes = [8, 32], strides = [1, 1]} : vector<8x128xf32> to vector<8x32xf32>
    %cst_17 = arith.constant 5.000000e-01 : f32
    %28 = vector.broadcast %cst_17 : f32 to vector<8x32xf32>
    %29 = arith.mulf %28, %27 : vector<8x32xf32>
    %cst_18 = arith.constant 5.000000e-01 : f32
    %30 = vector.broadcast %cst_18 : f32 to vector<8x32xf32>
    %31 = arith.addf %29, %30 : vector<8x32xf32>
    %32 = vector.extract_strided_slice %21 {offsets = [0, 64], sizes = [8, 32], strides = [1, 1]} : vector<8x128xf32> to vector<8x32xf32>
    %33 = vector.extract_strided_slice %21 {offsets = [0, 96], sizes = [8, 32], strides = [1, 1]} : vector<8x128xf32> to vector<8x32xf32>
    %cst_19 = arith.constant 5.000000e-01 : f32
    %34 = vector.broadcast %cst_19 : f32 to vector<8x32xf32>
    %35 = arith.mulf %34, %33 : vector<8x32xf32>
    %cst_20 = arith.constant 5.000000e-01 : f32
    %36 = vector.broadcast %cst_20 : f32 to vector<8x32xf32>
    %37 = arith.addf %35, %36 : vector<8x32xf32>
    %38 = arith.mulf %31, %13 : vector<8x32xf32>
    %39 = arith.mulf %26, %32 : vector<8x32xf32>
    %40 = arith.addf %38, %39 : vector<8x32xf32>
    %41 = math.tanh %40 : vector<8x32xf32>
    %42 = arith.mulf %37, %41 : vector<8x32xf32>
    %43 = vector.broadcast %c0_i32 : i32 to vector<8x1xi32>
    %44 = arith.cmpi slt, %43, %7 : vector<8x1xi32>
    %45 = vector.broadcast %14 : i32 to vector<8x1xi32>
    %46 = arith.cmpi slt, %45, %7 : vector<8x1xi32>
    %47 = vector.extract_strided_slice %42 {offsets = [0, 0], sizes = [8, 16], strides = [1, 1]} : vector<8x32xf32> to vector<8x16xf32>
    %cst_21 = arith.constant 0.000000e+00 : f32
    %48 = vector.shape_cast %44 : vector<8x1xi1> to vector<8x1xi1>
    %49 = vector.broadcast %48 : vector<8x1xi1> to vector<8x16xi1>
    %50 = vector.broadcast %cst_21 : f32 to vector<8x16xf32>
    %51 = arith.select %49, %47, %50 : vector<8x16xi1>, vector<8x16xf32>
    %c8_i32_22 = arith.constant 8 : i32
    %52 = arith.muli %c0_i32, %c8_i32_22 : i32
    %53 = arith.index_cast %52 : i32 to index
    %c0_23 = arith.constant 0 : index
    %54 = vector.load %arg5[%53, %c0_23] : memref<64x32xf32, #tpu.memory_space<vmem>>, vector<8x16xf32>
    tpu.vector_store %arg5[%53, %c0_23], %51 {strides = array<i32>} : memref<64x32xf32, #tpu.memory_space<vmem>>, vector<8x16xf32>,
    %55 = vector.extract_strided_slice %42 {offsets = [0, 16], sizes = [8, 16], strides = [1, 1]} : vector<8x32xf32> to vector<8x16xf32>
    %cst_24 = arith.constant 0.000000e+00 : f32
    %56 = vector.shape_cast %46 : vector<8x1xi1> to vector<8x1xi1>
    %57 = vector.broadcast %56 : vector<8x1xi1> to vector<8x16xi1>
    %58 = vector.broadcast %cst_24 : f32 to vector<8x16xf32>
    %59 = arith.select %57, %55, %58 : vector<8x16xi1>, vector<8x16xf32>
    %c8_i32_25 = arith.constant 8 : i32
    %60 = arith.muli %14, %c8_i32_25 : i32
    %61 = arith.index_cast %60 : i32 to index
    %c16 = arith.constant 16 : index
    %62 = vector.load %arg5[%61, %c16] : memref<64x32xf32, #tpu.memory_space<vmem>>, vector<8x16xf32>
    tpu.vector_store %arg5[%61, %c16], %59 {strides = array<i32>} : memref<64x32xf32, #tpu.memory_space<vmem>>, vector<8x16xf32>,
    %63 = vector.broadcast %46 : vector<8x1xi1> to vector<8x32xi1>
    %64 = arith.ori %11, %63 : vector<8x32xi1>
    %65 = arith.select %64, %42, %12 : vector<8x32xi1>, vector<8x32xf32>
    %66 = arith.select %64, %40, %13 : vector<8x32xi1>, vector<8x32xf32>
    %c1_i32 = arith.constant 1 : i32
    %c7_i32_26 = arith.constant 7 : i32
    %67 = arith.subi %c7_i32_26, %c1_i32 : i32
    %c8_i32_27 = arith.constant 8 : i32
    %68 = arith.muli %c1_i32, %c8_i32_27 : i32
    %69 = arith.index_cast %68 : i32 to index
    %c0_28 = arith.constant 0 : index
    %70 = vector.load %arg6[%69, %c0_28] : memref<64x128xf32, #tpu.memory_space<vmem>>, vector<8x128xf32>
    %71 = arith.truncf %65 : vector<8x32xf32> to vector<8x32xbf16>
    %cst_29 = arith.constant dense<0.000000e+00> : vector<8x128xf32>
    %72 = tpu.matmul %71, %8, %cst_29 {dimension_numbers = #tpu.dot_dimension_numbers<[1], [0], [0], [1], [0, 0, 1, 1], [], []>} : vector<8x32xbf16>, vector<32x128xbf16>, vector<8x128xf32> -> vector<8x128xf32>
    %73 = arith.addf %70, %72 : vector<8x128xf32>
    %74 = math.tanh %73 : vector<8x128xf32>
    %75 = vector.extract_strided_slice %74 {offsets = [0, 0], sizes = [8, 32], strides = [1, 1]} : vector<8x128xf32> to vector<8x32xf32>
    %cst_30 = arith.constant 5.000000e-01 : f32
    %76 = vector.broadcast %cst_30 : f32 to vector<8x32xf32>
    %77 = arith.mulf %76, %75 : vector<8x32xf32>
    %cst_31 = arith.constant 5.000000e-01 : f32
    %78 = vector.broadcast %cst_31 : f32 to vector<8x32xf32>
    %79 = arith.addf %77, %78 : vector<8x32xf32>
    %80 = vector.extract_strided_slice %74 {offsets = [0, 32], sizes = [8, 32], strides = [1, 1]} : vector<8x128xf32> to vector<8x32xf32>
    %cst_32 = arith.constant 5.000000e-01 : f32
    %81 = vector.broadcast %cst_32 : f32 to vector<8x32xf32>
    %82 = arith.mulf %81, %80 : vector<8x32xf32>
    %cst_33 = arith.constant 5.000000e-01 : f32
    %83 = vector.broadcast %cst_33 : f32 to vector<8x32xf32>
    %84 = arith.addf %82, %83 : vector<8x32xf32>
    %85 = vector.extract_strided_slice %74 {offsets = [0, 64], sizes = [8, 32], strides = [1, 1]} : vector<8x128xf32> to vector<8x32xf32>
    %86 = vector.extract_strided_slice %74 {offsets = [0, 96], sizes = [8, 32], strides = [1, 1]} : vector<8x128xf32> to vector<8x32xf32>
    %cst_34 = arith.constant 5.000000e-01 : f32
    %87 = vector.broadcast %cst_34 : f32 to vector<8x32xf32>
    %88 = arith.mulf %87, %86 : vector<8x32xf32>
    %cst_35 = arith.constant 5.000000e-01 : f32
    %89 = vector.broadcast %cst_35 : f32 to vector<8x32xf32>
    %90 = arith.addf %88, %89 : vector<8x32xf32>
    %91 = arith.mulf %84, %66 : vector<8x32xf32>
    %92 = arith.mulf %79, %85 : vector<8x32xf32>
    %93 = arith.addf %91, %92 : vector<8x32xf32>
    %94 = math.tanh %93 : vector<8x32xf32>
    %95 = arith.mulf %90, %94 : vector<8x32xf32>
    %96 = vector.broadcast %c1_i32 : i32 to vector<8x1xi32>
    %97 = arith.cmpi slt, %96, %7 : vector<8x1xi32>
    %98 = vector.broadcast %67 : i32 to vector<8x1xi32>
    %99 = arith.cmpi slt, %98, %7 : vector<8x1xi32>
    %100 = vector.extract_strided_slice %95 {offsets = [0, 0], sizes = [8, 16], strides = [1, 1]} : vector<8x32xf32> to vector<8x16xf32>
    %cst_36 = arith.constant 0.000000e+00 : f32
    %101 = vector.shape_cast %97 : vector<8x1xi1> to vector<8x1xi1>
    %102 = vector.broadcast %101 : vector<8x1xi1> to vector<8x16xi1>
    %103 = vector.broadcast %cst_36 : f32 to vector<8x16xf32>
    %104 = arith.select %102, %100, %103 : vector<8x16xi1>, vector<8x16xf32>
    %c8_i32_37 = arith.constant 8 : i32
    %105 = arith.muli %c1_i32, %c8_i32_37 : i32
    %106 = arith.index_cast %105 : i32 to index
    %c0_38 = arith.constant 0 : index
    %107 = vector.load %arg5[%106, %c0_38] : memref<64x32xf32, #tpu.memory_space<vmem>>, vector<8x16xf32>
    tpu.vector_store %arg5[%106, %c0_38], %104 {strides = array<i32>} : memref<64x32xf32, #tpu.memory_space<vmem>>, vector<8x16xf32>,
    %108 = vector.extract_strided_slice %95 {offsets = [0, 16], sizes = [8, 16], strides = [1, 1]} : vector<8x32xf32> to vector<8x16xf32>
    %cst_39 = arith.constant 0.000000e+00 : f32
    %109 = vector.shape_cast %99 : vector<8x1xi1> to vector<8x1xi1>
    %110 = vector.broadcast %109 : vector<8x1xi1> to vector<8x16xi1>
    %111 = vector.broadcast %cst_39 : f32 to vector<8x16xf32>
    %112 = arith.select %110, %108, %111 : vector<8x16xi1>, vector<8x16xf32>
    %c8_i32_40 = arith.constant 8 : i32
    %113 = arith.muli %67, %c8_i32_40 : i32
    %114 = arith.index_cast %113 : i32 to index
    %c16_41 = arith.constant 16 : index
    %115 = vector.load %arg5[%114, %c16_41] : memref<64x32xf32, #tpu.memory_space<vmem>>, vector<8x16xf32>
    tpu.vector_store %arg5[%114, %c16_41], %112 {strides = array<i32>} : memref<64x32xf32, #tpu.memory_space<vmem>>, vector<8x16xf32>,
    %116 = vector.broadcast %99 : vector<8x1xi1> to vector<8x32xi1>
    %117 = arith.ori %11, %116 : vector<8x32xi1>
    %118 = arith.select %117, %95, %65 : vector<8x32xi1>, vector<8x32xf32>
    %119 = arith.select %117, %93, %66 : vector<8x32xi1>, vector<8x32xf32>
    %c2_i32 = arith.constant 2 : i32
    %c7_i32_42 = arith.constant 7 : i32
    %120 = arith.subi %c7_i32_42, %c2_i32 : i32
    %c8_i32_43 = arith.constant 8 : i32
    %121 = arith.muli %c2_i32, %c8_i32_43 : i32
    %122 = arith.index_cast %121 : i32 to index
    %c0_44 = arith.constant 0 : index
    %123 = vector.load %arg6[%122, %c0_44] : memref<64x128xf32, #tpu.memory_space<vmem>>, vector<8x128xf32>
    %124 = arith.truncf %118 : vector<8x32xf32> to vector<8x32xbf16>
    %cst_45 = arith.constant dense<0.000000e+00> : vector<8x128xf32>
    %125 = tpu.matmul %124, %8, %cst_45 {dimension_numbers = #tpu.dot_dimension_numbers<[1], [0], [0], [1], [0, 0, 1, 1], [], []>} : vector<8x32xbf16>, vector<32x128xbf16>, vector<8x128xf32> -> vector<8x128xf32>
    %126 = arith.addf %123, %125 : vector<8x128xf32>
    %127 = math.tanh %126 : vector<8x128xf32>
    %128 = vector.extract_strided_slice %127 {offsets = [0, 0], sizes = [8, 32], strides = [1, 1]} : vector<8x128xf32> to vector<8x32xf32>
    %cst_46 = arith.constant 5.000000e-01 : f32
    %129 = vector.broadcast %cst_46 : f32 to vector<8x32xf32>
    %130 = arith.mulf %129, %128 : vector<8x32xf32>
    %cst_47 = arith.constant 5.000000e-01 : f32
    %131 = vector.broadcast %cst_47 : f32 to vector<8x32xf32>
    %132 = arith.addf %130, %131 : vector<8x32xf32>
    %133 = vector.extract_strided_slice %127 {offsets = [0, 32], sizes = [8, 32], strides = [1, 1]} : vector<8x128xf32> to vector<8x32xf32>
    %cst_48 = arith.constant 5.000000e-01 : f32
    %134 = vector.broadcast %cst_48 : f32 to vector<8x32xf32>
    %135 = arith.mulf %134, %133 : vector<8x32xf32>
    %cst_49 = arith.constant 5.000000e-01 : f32
    %136 = vector.broadcast %cst_49 : f32 to vector<8x32xf32>
    %137 = arith.addf %135, %136 : vector<8x32xf32>
    %138 = vector.extract_strided_slice %127 {offsets = [0, 64], sizes = [8, 32], strides = [1, 1]} : vector<8x128xf32> to vector<8x32xf32>
    %139 = vector.extract_strided_slice %127 {offsets = [0, 96], sizes = [8, 32], strides = [1, 1]} : vector<8x128xf32> to vector<8x32xf32>
    %cst_50 = arith.constant 5.000000e-01 : f32
    %140 = vector.broadcast %cst_50 : f32 to vector<8x32xf32>
    %141 = arith.mulf %140, %139 : vector<8x32xf32>
    %cst_51 = arith.constant 5.000000e-01 : f32
    %142 = vector.broadcast %cst_51 : f32 to vector<8x32xf32>
    %143 = arith.addf %141, %142 : vector<8x32xf32>
    %144 = arith.mulf %137, %119 : vector<8x32xf32>
    %145 = arith.mulf %132, %138 : vector<8x32xf32>
    %146 = arith.addf %144, %145 : vector<8x32xf32>
    %147 = math.tanh %146 : vector<8x32xf32>
    %148 = arith.mulf %143, %147 : vector<8x32xf32>
    %149 = vector.broadcast %c2_i32 : i32 to vector<8x1xi32>
    %150 = arith.cmpi slt, %149, %7 : vector<8x1xi32>
    %151 = vector.broadcast %120 : i32 to vector<8x1xi32>
    %152 = arith.cmpi slt, %151, %7 : vector<8x1xi32>
    %153 = vector.extract_strided_slice %148 {offsets = [0, 0], sizes = [8, 16], strides = [1, 1]} : vector<8x32xf32> to vector<8x16xf32>
    %cst_52 = arith.constant 0.000000e+00 : f32
    %154 = vector.shape_cast %150 : vector<8x1xi1> to vector<8x1xi1>
    %155 = vector.broadcast %154 : vector<8x1xi1> to vector<8x16xi1>
    %156 = vector.broadcast %cst_52 : f32 to vector<8x16xf32>
    %157 = arith.select %155, %153, %156 : vector<8x16xi1>, vector<8x16xf32>
    %c8_i32_53 = arith.constant 8 : i32
    %158 = arith.muli %c2_i32, %c8_i32_53 : i32
    %159 = arith.index_cast %158 : i32 to index
    %c0_54 = arith.constant 0 : index
    %160 = vector.load %arg5[%159, %c0_54] : memref<64x32xf32, #tpu.memory_space<vmem>>, vector<8x16xf32>
    tpu.vector_store %arg5[%159, %c0_54], %157 {strides = array<i32>} : memref<64x32xf32, #tpu.memory_space<vmem>>, vector<8x16xf32>,
    %161 = vector.extract_strided_slice %148 {offsets = [0, 16], sizes = [8, 16], strides = [1, 1]} : vector<8x32xf32> to vector<8x16xf32>
    %cst_55 = arith.constant 0.000000e+00 : f32
    %162 = vector.shape_cast %152 : vector<8x1xi1> to vector<8x1xi1>
    %163 = vector.broadcast %162 : vector<8x1xi1> to vector<8x16xi1>
    %164 = vector.broadcast %cst_55 : f32 to vector<8x16xf32>
    %165 = arith.select %163, %161, %164 : vector<8x16xi1>, vector<8x16xf32>
    %c8_i32_56 = arith.constant 8 : i32
    %166 = arith.muli %120, %c8_i32_56 : i32
    %167 = arith.index_cast %166 : i32 to index
    %c16_57 = arith.constant 16 : index
    %168 = vector.load %arg5[%167, %c16_57] : memref<64x32xf32, #tpu.memory_space<vmem>>, vector<8x16xf32>
    tpu.vector_store %arg5[%167, %c16_57], %165 {strides = array<i32>} : memref<64x32xf32, #tpu.memory_space<vmem>>, vector<8x16xf32>,
    %169 = vector.broadcast %152 : vector<8x1xi1> to vector<8x32xi1>
    %170 = arith.ori %11, %169 : vector<8x32xi1>
    %171 = arith.select %170, %148, %118 : vector<8x32xi1>, vector<8x32xf32>
    %172 = arith.select %170, %146, %119 : vector<8x32xi1>, vector<8x32xf32>
    %c3_i32 = arith.constant 3 : i32
    %c7_i32_58 = arith.constant 7 : i32
    %173 = arith.subi %c7_i32_58, %c3_i32 : i32
    %c8_i32_59 = arith.constant 8 : i32
    %174 = arith.muli %c3_i32, %c8_i32_59 : i32
    %175 = arith.index_cast %174 : i32 to index
    %c0_60 = arith.constant 0 : index
    %176 = vector.load %arg6[%175, %c0_60] : memref<64x128xf32, #tpu.memory_space<vmem>>, vector<8x128xf32>
    %177 = arith.truncf %171 : vector<8x32xf32> to vector<8x32xbf16>
    %cst_61 = arith.constant dense<0.000000e+00> : vector<8x128xf32>
    %178 = tpu.matmul %177, %8, %cst_61 {dimension_numbers = #tpu.dot_dimension_numbers<[1], [0], [0], [1], [0, 0, 1, 1], [], []>} : vector<8x32xbf16>, vector<32x128xbf16>, vector<8x128xf32> -> vector<8x128xf32>
    %179 = arith.addf %176, %178 : vector<8x128xf32>
    %180 = math.tanh %179 : vector<8x128xf32>
    %181 = vector.extract_strided_slice %180 {offsets = [0, 0], sizes = [8, 32], strides = [1, 1]} : vector<8x128xf32> to vector<8x32xf32>
    %cst_62 = arith.constant 5.000000e-01 : f32
    %182 = vector.broadcast %cst_62 : f32 to vector<8x32xf32>
    %183 = arith.mulf %182, %181 : vector<8x32xf32>
    %cst_63 = arith.constant 5.000000e-01 : f32
    %184 = vector.broadcast %cst_63 : f32 to vector<8x32xf32>
    %185 = arith.addf %183, %184 : vector<8x32xf32>
    %186 = vector.extract_strided_slice %180 {offsets = [0, 32], sizes = [8, 32], strides = [1, 1]} : vector<8x128xf32> to vector<8x32xf32>
    %cst_64 = arith.constant 5.000000e-01 : f32
    %187 = vector.broadcast %cst_64 : f32 to vector<8x32xf32>
    %188 = arith.mulf %187, %186 : vector<8x32xf32>
    %cst_65 = arith.constant 5.000000e-01 : f32
    %189 = vector.broadcast %cst_65 : f32 to vector<8x32xf32>
    %190 = arith.addf %188, %189 : vector<8x32xf32>
    %191 = vector.extract_strided_slice %180 {offsets = [0, 64], sizes = [8, 32], strides = [1, 1]} : vector<8x128xf32> to vector<8x32xf32>
    %192 = vector.extract_strided_slice %180 {offsets = [0, 96], sizes = [8, 32], strides = [1, 1]} : vector<8x128xf32> to vector<8x32xf32>
    %cst_66 = arith.constant 5.000000e-01 : f32
    %193 = vector.broadcast %cst_66 : f32 to vector<8x32xf32>
    %194 = arith.mulf %193, %192 : vector<8x32xf32>
    %cst_67 = arith.constant 5.000000e-01 : f32
    %195 = vector.broadcast %cst_67 : f32 to vector<8x32xf32>
    %196 = arith.addf %194, %195 : vector<8x32xf32>
    %197 = arith.mulf %190, %172 : vector<8x32xf32>
    %198 = arith.mulf %185, %191 : vector<8x32xf32>
    %199 = arith.addf %197, %198 : vector<8x32xf32>
    %200 = math.tanh %199 : vector<8x32xf32>
    %201 = arith.mulf %196, %200 : vector<8x32xf32>
    %202 = vector.broadcast %c3_i32 : i32 to vector<8x1xi32>
    %203 = arith.cmpi slt, %202, %7 : vector<8x1xi32>
    %204 = vector.broadcast %173 : i32 to vector<8x1xi32>
    %205 = arith.cmpi slt, %204, %7 : vector<8x1xi32>
    %206 = vector.extract_strided_slice %201 {offsets = [0, 0], sizes = [8, 16], strides = [1, 1]} : vector<8x32xf32> to vector<8x16xf32>
    %cst_68 = arith.constant 0.000000e+00 : f32
    %207 = vector.shape_cast %203 : vector<8x1xi1> to vector<8x1xi1>
    %208 = vector.broadcast %207 : vector<8x1xi1> to vector<8x16xi1>
    %209 = vector.broadcast %cst_68 : f32 to vector<8x16xf32>
    %210 = arith.select %208, %206, %209 : vector<8x16xi1>, vector<8x16xf32>
    %c8_i32_69 = arith.constant 8 : i32
    %211 = arith.muli %c3_i32, %c8_i32_69 : i32
    %212 = arith.index_cast %211 : i32 to index
    %c0_70 = arith.constant 0 : index
    %213 = vector.load %arg5[%212, %c0_70] : memref<64x32xf32, #tpu.memory_space<vmem>>, vector<8x16xf32>
    tpu.vector_store %arg5[%212, %c0_70], %210 {strides = array<i32>} : memref<64x32xf32, #tpu.memory_space<vmem>>, vector<8x16xf32>,
    %214 = vector.extract_strided_slice %201 {offsets = [0, 16], sizes = [8, 16], strides = [1, 1]} : vector<8x32xf32> to vector<8x16xf32>
    %cst_71 = arith.constant 0.000000e+00 : f32
    %215 = vector.shape_cast %205 : vector<8x1xi1> to vector<8x1xi1>
    %216 = vector.broadcast %215 : vector<8x1xi1> to vector<8x16xi1>
    %217 = vector.broadcast %cst_71 : f32 to vector<8x16xf32>
    %218 = arith.select %216, %214, %217 : vector<8x16xi1>, vector<8x16xf32>
    %c8_i32_72 = arith.constant 8 : i32
    %219 = arith.muli %173, %c8_i32_72 : i32
    %220 = arith.index_cast %219 : i32 to index
    %c16_73 = arith.constant 16 : index
    %221 = vector.load %arg5[%220, %c16_73] : memref<64x32xf32, #tpu.memory_space<vmem>>, vector<8x16xf32>
    tpu.vector_store %arg5[%220, %c16_73], %218 {strides = array<i32>} : memref<64x32xf32, #tpu.memory_space<vmem>>, vector<8x16xf32>,
    %222 = vector.broadcast %205 : vector<8x1xi1> to vector<8x32xi1>
    %223 = arith.ori %11, %222 : vector<8x32xi1>
    %224 = arith.select %223, %201, %171 : vector<8x32xi1>, vector<8x32xf32>
    %225 = arith.select %223, %199, %172 : vector<8x32xi1>, vector<8x32xf32>
    %c4_i32 = arith.constant 4 : i32
    %c7_i32_74 = arith.constant 7 : i32
    %226 = arith.subi %c7_i32_74, %c4_i32 : i32
    %c8_i32_75 = arith.constant 8 : i32
    %227 = arith.muli %c4_i32, %c8_i32_75 : i32
    %228 = arith.index_cast %227 : i32 to index
    %c0_76 = arith.constant 0 : index
    %229 = vector.load %arg6[%228, %c0_76] : memref<64x128xf32, #tpu.memory_space<vmem>>, vector<8x128xf32>
    %230 = arith.truncf %224 : vector<8x32xf32> to vector<8x32xbf16>
    %cst_77 = arith.constant dense<0.000000e+00> : vector<8x128xf32>
    %231 = tpu.matmul %230, %8, %cst_77 {dimension_numbers = #tpu.dot_dimension_numbers<[1], [0], [0], [1], [0, 0, 1, 1], [], []>} : vector<8x32xbf16>, vector<32x128xbf16>, vector<8x128xf32> -> vector<8x128xf32>
    %232 = arith.addf %229, %231 : vector<8x128xf32>
    %233 = math.tanh %232 : vector<8x128xf32>
    %234 = vector.extract_strided_slice %233 {offsets = [0, 0], sizes = [8, 32], strides = [1, 1]} : vector<8x128xf32> to vector<8x32xf32>
    %cst_78 = arith.constant 5.000000e-01 : f32
    %235 = vector.broadcast %cst_78 : f32 to vector<8x32xf32>
    %236 = arith.mulf %235, %234 : vector<8x32xf32>
    %cst_79 = arith.constant 5.000000e-01 : f32
    %237 = vector.broadcast %cst_79 : f32 to vector<8x32xf32>
    %238 = arith.addf %236, %237 : vector<8x32xf32>
    %239 = vector.extract_strided_slice %233 {offsets = [0, 32], sizes = [8, 32], strides = [1, 1]} : vector<8x128xf32> to vector<8x32xf32>
    %cst_80 = arith.constant 5.000000e-01 : f32
    %240 = vector.broadcast %cst_80 : f32 to vector<8x32xf32>
    %241 = arith.mulf %240, %239 : vector<8x32xf32>
    %cst_81 = arith.constant 5.000000e-01 : f32
    %242 = vector.broadcast %cst_81 : f32 to vector<8x32xf32>
    %243 = arith.addf %241, %242 : vector<8x32xf32>
    %244 = vector.extract_strided_slice %233 {offsets = [0, 64], sizes = [8, 32], strides = [1, 1]} : vector<8x128xf32> to vector<8x32xf32>
    %245 = vector.extract_strided_slice %233 {offsets = [0, 96], sizes = [8, 32], strides = [1, 1]} : vector<8x128xf32> to vector<8x32xf32>
    %cst_82 = arith.constant 5.000000e-01 : f32
    %246 = vector.broadcast %cst_82 : f32 to vector<8x32xf32>
    %247 = arith.mulf %246, %245 : vector<8x32xf32>
    %cst_83 = arith.constant 5.000000e-01 : f32
    %248 = vector.broadcast %cst_83 : f32 to vector<8x32xf32>
    %249 = arith.addf %247, %248 : vector<8x32xf32>
    %250 = arith.mulf %243, %225 : vector<8x32xf32>
    %251 = arith.mulf %238, %244 : vector<8x32xf32>
    %252 = arith.addf %250, %251 : vector<8x32xf32>
    %253 = math.tanh %252 : vector<8x32xf32>
    %254 = arith.mulf %249, %253 : vector<8x32xf32>
    %255 = vector.broadcast %c4_i32 : i32 to vector<8x1xi32>
    %256 = arith.cmpi slt, %255, %7 : vector<8x1xi32>
    %257 = vector.broadcast %226 : i32 to vector<8x1xi32>
    %258 = arith.cmpi slt, %257, %7 : vector<8x1xi32>
    %259 = vector.extract_strided_slice %254 {offsets = [0, 0], sizes = [8, 16], strides = [1, 1]} : vector<8x32xf32> to vector<8x16xf32>
    %cst_84 = arith.constant 0.000000e+00 : f32
    %260 = vector.shape_cast %256 : vector<8x1xi1> to vector<8x1xi1>
    %261 = vector.broadcast %260 : vector<8x1xi1> to vector<8x16xi1>
    %262 = vector.broadcast %cst_84 : f32 to vector<8x16xf32>
    %263 = arith.select %261, %259, %262 : vector<8x16xi1>, vector<8x16xf32>
    %c8_i32_85 = arith.constant 8 : i32
    %264 = arith.muli %c4_i32, %c8_i32_85 : i32
    %265 = arith.index_cast %264 : i32 to index
    %c0_86 = arith.constant 0 : index
    %266 = vector.load %arg5[%265, %c0_86] : memref<64x32xf32, #tpu.memory_space<vmem>>, vector<8x16xf32>
    tpu.vector_store %arg5[%265, %c0_86], %263 {strides = array<i32>} : memref<64x32xf32, #tpu.memory_space<vmem>>, vector<8x16xf32>,
    %267 = vector.extract_strided_slice %254 {offsets = [0, 16], sizes = [8, 16], strides = [1, 1]} : vector<8x32xf32> to vector<8x16xf32>
    %cst_87 = arith.constant 0.000000e+00 : f32
    %268 = vector.shape_cast %258 : vector<8x1xi1> to vector<8x1xi1>
    %269 = vector.broadcast %268 : vector<8x1xi1> to vector<8x16xi1>
    %270 = vector.broadcast %cst_87 : f32 to vector<8x16xf32>
    %271 = arith.select %269, %267, %270 : vector<8x16xi1>, vector<8x16xf32>
    %c8_i32_88 = arith.constant 8 : i32
    %272 = arith.muli %226, %c8_i32_88 : i32
    %273 = arith.index_cast %272 : i32 to index
    %c16_89 = arith.constant 16 : index
    %274 = vector.load %arg5[%273, %c16_89] : memref<64x32xf32, #tpu.memory_space<vmem>>, vector<8x16xf32>
    tpu.vector_store %arg5[%273, %c16_89], %271 {strides = array<i32>} : memref<64x32xf32, #tpu.memory_space<vmem>>, vector<8x16xf32>,
    %275 = vector.broadcast %258 : vector<8x1xi1> to vector<8x32xi1>
    %276 = arith.ori %11, %275 : vector<8x32xi1>
    %277 = arith.select %276, %254, %224 : vector<8x32xi1>, vector<8x32xf32>
    %278 = arith.select %276, %252, %225 : vector<8x32xi1>, vector<8x32xf32>
    %c5_i32 = arith.constant 5 : i32
    %c7_i32_90 = arith.constant 7 : i32
    %279 = arith.subi %c7_i32_90, %c5_i32 : i32
    %c8_i32_91 = arith.constant 8 : i32
    %280 = arith.muli %c5_i32, %c8_i32_91 : i32
    %281 = arith.index_cast %280 : i32 to index
    %c0_92 = arith.constant 0 : index
    %282 = vector.load %arg6[%281, %c0_92] : memref<64x128xf32, #tpu.memory_space<vmem>>, vector<8x128xf32>
    %283 = arith.truncf %277 : vector<8x32xf32> to vector<8x32xbf16>
    %cst_93 = arith.constant dense<0.000000e+00> : vector<8x128xf32>
    %284 = tpu.matmul %283, %8, %cst_93 {dimension_numbers = #tpu.dot_dimension_numbers<[1], [0], [0], [1], [0, 0, 1, 1], [], []>} : vector<8x32xbf16>, vector<32x128xbf16>, vector<8x128xf32> -> vector<8x128xf32>
    %285 = arith.addf %282, %284 : vector<8x128xf32>
    %286 = math.tanh %285 : vector<8x128xf32>
    %287 = vector.extract_strided_slice %286 {offsets = [0, 0], sizes = [8, 32], strides = [1, 1]} : vector<8x128xf32> to vector<8x32xf32>
    %cst_94 = arith.constant 5.000000e-01 : f32
    %288 = vector.broadcast %cst_94 : f32 to vector<8x32xf32>
    %289 = arith.mulf %288, %287 : vector<8x32xf32>
    %cst_95 = arith.constant 5.000000e-01 : f32
    %290 = vector.broadcast %cst_95 : f32 to vector<8x32xf32>
    %291 = arith.addf %289, %290 : vector<8x32xf32>
    %292 = vector.extract_strided_slice %286 {offsets = [0, 32], sizes = [8, 32], strides = [1, 1]} : vector<8x128xf32> to vector<8x32xf32>
    %cst_96 = arith.constant 5.000000e-01 : f32
    %293 = vector.broadcast %cst_96 : f32 to vector<8x32xf32>
    %294 = arith.mulf %293, %292 : vector<8x32xf32>
    %cst_97 = arith.constant 5.000000e-01 : f32
    %295 = vector.broadcast %cst_97 : f32 to vector<8x32xf32>
    %296 = arith.addf %294, %295 : vector<8x32xf32>
    %297 = vector.extract_strided_slice %286 {offsets = [0, 64], sizes = [8, 32], strides = [1, 1]} : vector<8x128xf32> to vector<8x32xf32>
    %298 = vector.extract_strided_slice %286 {offsets = [0, 96], sizes = [8, 32], strides = [1, 1]} : vector<8x128xf32> to vector<8x32xf32>
    %cst_98 = arith.constant 5.000000e-01 : f32
    %299 = vector.broadcast %cst_98 : f32 to vector<8x32xf32>
    %300 = arith.mulf %299, %298 : vector<8x32xf32>
    %cst_99 = arith.constant 5.000000e-01 : f32
    %301 = vector.broadcast %cst_99 : f32 to vector<8x32xf32>
    %302 = arith.addf %300, %301 : vector<8x32xf32>
    %303 = arith.mulf %296, %278 : vector<8x32xf32>
    %304 = arith.mulf %291, %297 : vector<8x32xf32>
    %305 = arith.addf %303, %304 : vector<8x32xf32>
    %306 = math.tanh %305 : vector<8x32xf32>
    %307 = arith.mulf %302, %306 : vector<8x32xf32>
    %308 = vector.broadcast %c5_i32 : i32 to vector<8x1xi32>
    %309 = arith.cmpi slt, %308, %7 : vector<8x1xi32>
    %310 = vector.broadcast %279 : i32 to vector<8x1xi32>
    %311 = arith.cmpi slt, %310, %7 : vector<8x1xi32>
    %312 = vector.extract_strided_slice %307 {offsets = [0, 0], sizes = [8, 16], strides = [1, 1]} : vector<8x32xf32> to vector<8x16xf32>
    %cst_100 = arith.constant 0.000000e+00 : f32
    %313 = vector.shape_cast %309 : vector<8x1xi1> to vector<8x1xi1>
    %314 = vector.broadcast %313 : vector<8x1xi1> to vector<8x16xi1>
    %315 = vector.broadcast %cst_100 : f32 to vector<8x16xf32>
    %316 = arith.select %314, %312, %315 : vector<8x16xi1>, vector<8x16xf32>
    %c8_i32_101 = arith.constant 8 : i32
    %317 = arith.muli %c5_i32, %c8_i32_101 : i32
    %318 = arith.index_cast %317 : i32 to index
    %c0_102 = arith.constant 0 : index
    %319 = vector.load %arg5[%318, %c0_102] : memref<64x32xf32, #tpu.memory_space<vmem>>, vector<8x16xf32>
    tpu.vector_store %arg5[%318, %c0_102], %316 {strides = array<i32>} : memref<64x32xf32, #tpu.memory_space<vmem>>, vector<8x16xf32>,
    %320 = vector.extract_strided_slice %307 {offsets = [0, 16], sizes = [8, 16], strides = [1, 1]} : vector<8x32xf32> to vector<8x16xf32>
    %cst_103 = arith.constant 0.000000e+00 : f32
    %321 = vector.shape_cast %311 : vector<8x1xi1> to vector<8x1xi1>
    %322 = vector.broadcast %321 : vector<8x1xi1> to vector<8x16xi1>
    %323 = vector.broadcast %cst_103 : f32 to vector<8x16xf32>
    %324 = arith.select %322, %320, %323 : vector<8x16xi1>, vector<8x16xf32>
    %c8_i32_104 = arith.constant 8 : i32
    %325 = arith.muli %279, %c8_i32_104 : i32
    %326 = arith.index_cast %325 : i32 to index
    %c16_105 = arith.constant 16 : index
    %327 = vector.load %arg5[%326, %c16_105] : memref<64x32xf32, #tpu.memory_space<vmem>>, vector<8x16xf32>
    tpu.vector_store %arg5[%326, %c16_105], %324 {strides = array<i32>} : memref<64x32xf32, #tpu.memory_space<vmem>>, vector<8x16xf32>,
    %328 = vector.broadcast %311 : vector<8x1xi1> to vector<8x32xi1>
    %329 = arith.ori %11, %328 : vector<8x32xi1>
    %330 = arith.select %329, %307, %277 : vector<8x32xi1>, vector<8x32xf32>
    %331 = arith.select %329, %305, %278 : vector<8x32xi1>, vector<8x32xf32>
    %c6_i32 = arith.constant 6 : i32
    %c7_i32_106 = arith.constant 7 : i32
    %332 = arith.subi %c7_i32_106, %c6_i32 : i32
    %c8_i32_107 = arith.constant 8 : i32
    %333 = arith.muli %c6_i32, %c8_i32_107 : i32
    %334 = arith.index_cast %333 : i32 to index
    %c0_108 = arith.constant 0 : index
    %335 = vector.load %arg6[%334, %c0_108] : memref<64x128xf32, #tpu.memory_space<vmem>>, vector<8x128xf32>
    %336 = arith.truncf %330 : vector<8x32xf32> to vector<8x32xbf16>
    %cst_109 = arith.constant dense<0.000000e+00> : vector<8x128xf32>
    %337 = tpu.matmul %336, %8, %cst_109 {dimension_numbers = #tpu.dot_dimension_numbers<[1], [0], [0], [1], [0, 0, 1, 1], [], []>} : vector<8x32xbf16>, vector<32x128xbf16>, vector<8x128xf32> -> vector<8x128xf32>
    %338 = arith.addf %335, %337 : vector<8x128xf32>
    %339 = math.tanh %338 : vector<8x128xf32>
    %340 = vector.extract_strided_slice %339 {offsets = [0, 0], sizes = [8, 32], strides = [1, 1]} : vector<8x128xf32> to vector<8x32xf32>
    %cst_110 = arith.constant 5.000000e-01 : f32
    %341 = vector.broadcast %cst_110 : f32 to vector<8x32xf32>
    %342 = arith.mulf %341, %340 : vector<8x32xf32>
    %cst_111 = arith.constant 5.000000e-01 : f32
    %343 = vector.broadcast %cst_111 : f32 to vector<8x32xf32>
    %344 = arith.addf %342, %343 : vector<8x32xf32>
    %345 = vector.extract_strided_slice %339 {offsets = [0, 32], sizes = [8, 32], strides = [1, 1]} : vector<8x128xf32> to vector<8x32xf32>
    %cst_112 = arith.constant 5.000000e-01 : f32
    %346 = vector.broadcast %cst_112 : f32 to vector<8x32xf32>
    %347 = arith.mulf %346, %345 : vector<8x32xf32>
    %cst_113 = arith.constant 5.000000e-01 : f32
    %348 = vector.broadcast %cst_113 : f32 to vector<8x32xf32>
    %349 = arith.addf %347, %348 : vector<8x32xf32>
    %350 = vector.extract_strided_slice %339 {offsets = [0, 64], sizes = [8, 32], strides = [1, 1]} : vector<8x128xf32> to vector<8x32xf32>
    %351 = vector.extract_strided_slice %339 {offsets = [0, 96], sizes = [8, 32], strides = [1, 1]} : vector<8x128xf32> to vector<8x32xf32>
    %cst_114 = arith.constant 5.000000e-01 : f32
    %352 = vector.broadcast %cst_114 : f32 to vector<8x32xf32>
    %353 = arith.mulf %352, %351 : vector<8x32xf32>
    %cst_115 = arith.constant 5.000000e-01 : f32
    %354 = vector.broadcast %cst_115 : f32 to vector<8x32xf32>
    %355 = arith.addf %353, %354 : vector<8x32xf32>
    %356 = arith.mulf %349, %331 : vector<8x32xf32>
    %357 = arith.mulf %344, %350 : vector<8x32xf32>
    %358 = arith.addf %356, %357 : vector<8x32xf32>
    %359 = math.tanh %358 : vector<8x32xf32>
    %360 = arith.mulf %355, %359 : vector<8x32xf32>
    %361 = vector.broadcast %c6_i32 : i32 to vector<8x1xi32>
    %362 = arith.cmpi slt, %361, %7 : vector<8x1xi32>
    %363 = vector.broadcast %332 : i32 to vector<8x1xi32>
    %364 = arith.cmpi slt, %363, %7 : vector<8x1xi32>
    %365 = vector.extract_strided_slice %360 {offsets = [0, 0], sizes = [8, 16], strides = [1, 1]} : vector<8x32xf32> to vector<8x16xf32>
    %cst_116 = arith.constant 0.000000e+00 : f32
    %366 = vector.shape_cast %362 : vector<8x1xi1> to vector<8x1xi1>
    %367 = vector.broadcast %366 : vector<8x1xi1> to vector<8x16xi1>
    %368 = vector.broadcast %cst_116 : f32 to vector<8x16xf32>
    %369 = arith.select %367, %365, %368 : vector<8x16xi1>, vector<8x16xf32>
    %c8_i32_117 = arith.constant 8 : i32
    %370 = arith.muli %c6_i32, %c8_i32_117 : i32
    %371 = arith.index_cast %370 : i32 to index
    %c0_118 = arith.constant 0 : index
    %372 = vector.load %arg5[%371, %c0_118] : memref<64x32xf32, #tpu.memory_space<vmem>>, vector<8x16xf32>
    tpu.vector_store %arg5[%371, %c0_118], %369 {strides = array<i32>} : memref<64x32xf32, #tpu.memory_space<vmem>>, vector<8x16xf32>,
    %373 = vector.extract_strided_slice %360 {offsets = [0, 16], sizes = [8, 16], strides = [1, 1]} : vector<8x32xf32> to vector<8x16xf32>
    %cst_119 = arith.constant 0.000000e+00 : f32
    %374 = vector.shape_cast %364 : vector<8x1xi1> to vector<8x1xi1>
    %375 = vector.broadcast %374 : vector<8x1xi1> to vector<8x16xi1>
    %376 = vector.broadcast %cst_119 : f32 to vector<8x16xf32>
    %377 = arith.select %375, %373, %376 : vector<8x16xi1>, vector<8x16xf32>
    %c8_i32_120 = arith.constant 8 : i32
    %378 = arith.muli %332, %c8_i32_120 : i32
    %379 = arith.index_cast %378 : i32 to index
    %c16_121 = arith.constant 16 : index
    %380 = vector.load %arg5[%379, %c16_121] : memref<64x32xf32, #tpu.memory_space<vmem>>, vector<8x16xf32>
    tpu.vector_store %arg5[%379, %c16_121], %377 {strides = array<i32>} : memref<64x32xf32, #tpu.memory_space<vmem>>, vector<8x16xf32>,
    %381 = vector.broadcast %364 : vector<8x1xi1> to vector<8x32xi1>
    %382 = arith.ori %11, %381 : vector<8x32xi1>
    %383 = arith.select %382, %360, %330 : vector<8x32xi1>, vector<8x32xf32>
    %384 = arith.select %382, %358, %331 : vector<8x32xi1>, vector<8x32xf32>
    %c7_i32_122 = arith.constant 7 : i32
    %c7_i32_123 = arith.constant 7 : i32
    %385 = arith.subi %c7_i32_123, %c7_i32_122 : i32
    %c8_i32_124 = arith.constant 8 : i32
    %386 = arith.muli %c7_i32_122, %c8_i32_124 : i32
    %387 = arith.index_cast %386 : i32 to index
    %c0_125 = arith.constant 0 : index
    %388 = vector.load %arg6[%387, %c0_125] : memref<64x128xf32, #tpu.memory_space<vmem>>, vector<8x128xf32>
    %389 = arith.truncf %383 : vector<8x32xf32> to vector<8x32xbf16>
    %cst_126 = arith.constant dense<0.000000e+00> : vector<8x128xf32>
    %390 = tpu.matmul %389, %8, %cst_126 {dimension_numbers = #tpu.dot_dimension_numbers<[1], [0], [0], [1], [0, 0, 1, 1], [], []>} : vector<8x32xbf16>, vector<32x128xbf16>, vector<8x128xf32> -> vector<8x128xf32>
    %391 = arith.addf %388, %390 : vector<8x128xf32>
    %392 = math.tanh %391 : vector<8x128xf32>
    %393 = vector.extract_strided_slice %392 {offsets = [0, 0], sizes = [8, 32], strides = [1, 1]} : vector<8x128xf32> to vector<8x32xf32>
    %cst_127 = arith.constant 5.000000e-01 : f32
    %394 = vector.broadcast %cst_127 : f32 to vector<8x32xf32>
    %395 = arith.mulf %394, %393 : vector<8x32xf32>
    %cst_128 = arith.constant 5.000000e-01 : f32
    %396 = vector.broadcast %cst_128 : f32 to vector<8x32xf32>
    %397 = arith.addf %395, %396 : vector<8x32xf32>
    %398 = vector.extract_strided_slice %392 {offsets = [0, 32], sizes = [8, 32], strides = [1, 1]} : vector<8x128xf32> to vector<8x32xf32>
    %cst_129 = arith.constant 5.000000e-01 : f32
    %399 = vector.broadcast %cst_129 : f32 to vector<8x32xf32>
    %400 = arith.mulf %399, %398 : vector<8x32xf32>
    %cst_130 = arith.constant 5.000000e-01 : f32
    %401 = vector.broadcast %cst_130 : f32 to vector<8x32xf32>
    %402 = arith.addf %400, %401 : vector<8x32xf32>
    %403 = vector.extract_strided_slice %392 {offsets = [0, 64], sizes = [8, 32], strides = [1, 1]} : vector<8x128xf32> to vector<8x32xf32>
    %404 = vector.extract_strided_slice %392 {offsets = [0, 96], sizes = [8, 32], strides = [1, 1]} : vector<8x128xf32> to vector<8x32xf32>
    %cst_131 = arith.constant 5.000000e-01 : f32
    %405 = vector.broadcast %cst_131 : f32 to vector<8x32xf32>
    %406 = arith.mulf %405, %404 : vector<8x32xf32>
    %cst_132 = arith.constant 5.000000e-01 : f32
    %407 = vector.broadcast %cst_132 : f32 to vector<8x32xf32>
    %408 = arith.addf %406, %407 : vector<8x32xf32>
    %409 = arith.mulf %402, %384 : vector<8x32xf32>
    %410 = arith.mulf %397, %403 : vector<8x32xf32>
    %411 = arith.addf %409, %410 : vector<8x32xf32>
    %412 = math.tanh %411 : vector<8x32xf32>
    %413 = arith.mulf %408, %412 : vector<8x32xf32>
    %414 = vector.broadcast %c7_i32_122 : i32 to vector<8x1xi32>
    %415 = arith.cmpi slt, %414, %7 : vector<8x1xi32>
    %416 = vector.broadcast %385 : i32 to vector<8x1xi32>
    %417 = arith.cmpi slt, %416, %7 : vector<8x1xi32>
    %418 = vector.extract_strided_slice %413 {offsets = [0, 0], sizes = [8, 16], strides = [1, 1]} : vector<8x32xf32> to vector<8x16xf32>
    %cst_133 = arith.constant 0.000000e+00 : f32
    %419 = vector.shape_cast %415 : vector<8x1xi1> to vector<8x1xi1>
    %420 = vector.broadcast %419 : vector<8x1xi1> to vector<8x16xi1>
    %421 = vector.broadcast %cst_133 : f32 to vector<8x16xf32>
    %422 = arith.select %420, %418, %421 : vector<8x16xi1>, vector<8x16xf32>
    %c8_i32_134 = arith.constant 8 : i32
    %423 = arith.muli %c7_i32_122, %c8_i32_134 : i32
    %424 = arith.index_cast %423 : i32 to index
    %c0_135 = arith.constant 0 : index
    %425 = vector.load %arg5[%424, %c0_135] : memref<64x32xf32, #tpu.memory_space<vmem>>, vector<8x16xf32>
    tpu.vector_store %arg5[%424, %c0_135], %422 {strides = array<i32>} : memref<64x32xf32, #tpu.memory_space<vmem>>, vector<8x16xf32>,
    %426 = vector.extract_strided_slice %413 {offsets = [0, 16], sizes = [8, 16], strides = [1, 1]} : vector<8x32xf32> to vector<8x16xf32>
    %cst_136 = arith.constant 0.000000e+00 : f32
    %427 = vector.shape_cast %417 : vector<8x1xi1> to vector<8x1xi1>
    %428 = vector.broadcast %427 : vector<8x1xi1> to vector<8x16xi1>
    %429 = vector.broadcast %cst_136 : f32 to vector<8x16xf32>
    %430 = arith.select %428, %426, %429 : vector<8x16xi1>, vector<8x16xf32>
    %c8_i32_137 = arith.constant 8 : i32
    %431 = arith.muli %385, %c8_i32_137 : i32
    %432 = arith.index_cast %431 : i32 to index
    %c16_138 = arith.constant 16 : index
    %433 = vector.load %arg5[%432, %c16_138] : memref<64x32xf32, #tpu.memory_space<vmem>>, vector<8x16xf32>
    tpu.vector_store %arg5[%432, %c16_138], %430 {strides = array<i32>} : memref<64x32xf32, #tpu.memory_space<vmem>>, vector<8x16xf32>,
    %434 = vector.broadcast %417 : vector<8x1xi1> to vector<8x32xi1>
    %435 = arith.ori %11, %434 : vector<8x32xi1>
    %436 = arith.select %435, %413, %383 : vector<8x32xi1>, vector<8x32xf32>
    %437 = arith.select %435, %411, %384 : vector<8x32xi1>, vector<8x32xf32>
    %c8_i32_139 = arith.constant 8 : i32
    return
  }
}

</mosaic_0001>

<bundles_post_ra>
// kernel: tpu_custom_call.1
= control target key start
LH: loop header
LB: loop body
LE: loop exit
PB: predicated region body
PF: predicated region fallthrough
CT: control target
= control target key end

     0   :  { %10 = vsyncpa [#allocation4], 0  ;;  %s1321_s0 = inlined_call_operand.vmem [shape: s32[8,1], index: 0, kind: input, shape index: {}]   ;;  %s1322_s1 = inlined_call_operand.hbm [shape: bf16[64,64], index: 1, kind: input, shape index: {}]   ;;  %s1323_s2 = inlined_call_operand.hbm [shape: bf16[64,128], index: 2, kind: input, shape index: {}]   ;;  %s1324_s3 = inlined_call_operand.hbm [shape: bf16[32,128], index: 3, kind: input, shape index: {}]   ;;  %s1325_s4 = inlined_call_operand.vmem [shape: f32[1,128], index: 4, kind: input, shape index: {}]   ;;  %s1326_s5 = inlined_call_operand.vmem [shape: f32[64,32], index: 5, kind: output, shape index: {}]  }
   0x1   :  { %11 = vsyncpa [#allocation6], 0  ;;  %s31_s20 = sshll.u32 %s1323_s2, 4  ;;  %s956_s21 = smov [#allocation5]   ;;  %s32_s20 = int_to_ptr.hbm [resolvable:$true] %s31_s20 }
   0x2   :  { %s33_s22 = sshll.u32 %s956_s21, 4  ;;  %s18_s25 = sshll.u32 %s1322_s1, 4  ;;  %s34_s22 = int_to_ptr.vmem [resolvable:$true] %s33_s22  ;;  %s19_s25 = int_to_ptr.hbm [resolvable:$true] %s18_s25 }
   0x3   :  { %s957_s26 = smov 64   ;;  %s958_s27 = smov 4  }
   0x4   :  { %39 = dma.hbm_to_vmem [thread:$0]  %s32_s20, 512, %s34_s22, [#allocation6], %s957_s26, %s957_s26, %s958_s27  }
   0x5   :  { %s959_s28 = smov [#allocation3]   ;;  %s44_s2 = sshll.u32 %s1324_s3, 4  ;;  %s45_s2 = int_to_ptr.hbm [resolvable:$true] %s44_s2 }
   0x6   :  { %s20_s29 = sshll.u32 %s959_s28, 4  ;;  %s960_s7 = smov [#allocation7]   ;;  %s21_s29 = int_to_ptr.vmem [resolvable:$true] %s20_s29 }
   0x7   :  { %26 = dma.hbm_to_vmem [thread:$0]  %s19_s25, 512, %s21_s29, [#allocation4], %s957_s26, %s957_s26, %s958_s27  }
   0x8   :  { %s46_s8 = sshll.u32 %s960_s7, 4  ;;  %s47_s8 = int_to_ptr.vmem [resolvable:$true] %s46_s8 }
   0x9   :  { %52 = dma.hbm_to_vmem [thread:$0]  %s45_s2, 256, %s47_s8, [#allocation6], %s957_s26, %s957_s26, %s958_s27  }
   0xa   :  { %952 = dma.done.wait [#allocation4], 512  }
   0xb   :  { %953 = vsyncadd [#allocation4], 4294966784 }
   0xc   :  { %954 = dma.done.wait [#allocation6], 768  }
   0xd   :  { %955 = vsyncadd [#allocation6], 4294966528  ;;  %v961_v0 = vmov 0   ;;  %v829_v1 = vld [vmem:[#allocation5 + $0x18] sm:$0xff]  ;;  %v1012_v2 = vld [vmem:[#allocation7 + $0x8] sm:$0xff]  ;;  %vm132_vm0 = vcmask 523264   ;;  %v187_v27 = vlaneseq }
   0xe   :  { %844 = vset.pattern.permute.xlu1 %v961_v0  ;;  %845 = vset.pattern.permute.xlu2 %v961_v0  ;;  %v828_v3 = vld [vmem:[#allocation5 + $0x10] sm:$0xff]  ;;  %v1015_v4 = vld [vmem:[#allocation7] sm:$0xff]  ;;  %v827_v5 = vld [vmem:[#allocation5 + $0x8] sm:$0xff]  ;;  %s962_s9 = smov 32   ;;  %s963_s11 = smov 96   ;;  %vm203_vm5 = vcmask 261120  }
   0xf   :  { %846 = vset.pattern.permute.xlu0 %v961_v0  ;;  %149 = vmatpush.bf16.msra.mxu0 %v829_v1  ;;  %v826_v6 = vld [vmem:[#allocation5] sm:$0xff]  ;;  %v1051_v28 = vand.u32 127, %v187_v27  ;;  %v825_v51 = vld [vmem:[#allocation3 + $0x18] sm:$0xff]  ;;  %v823_v52 = vld [vmem:[#allocation3 + $0x8] sm:$0xff] }
  0x10   :  { %213 = vmatpush.bf16.msra.mxu1 %v1012_v2  ;;  %289 = vmatpush.bf16.msra.mxu2 %v1012_v2  ;;  %v822_v7 = vld [vmem:[#allocation3] sm:$0xff] }
  0x11   :  { %832 = vmatpush.bf16.msra.mxu3 %v829_v1  ;;  %v1033_v9 = vld [vmem:[%s1325_s4] ss:$0 sm:$0xff]  ;;  %vm189_vm2 = vcmp.lt.s32.totalorder %v1051_v28, 16 }
  0x12   :  { %v1041_v23 = vld [vmem:[%s1321_s0] sm:$0xff] }
  0x13   :  { %150 = vmatpush.bf16.msra.mxu0 %v828_v3  ;;  %vm242_vm1 = vcmp.gt.s32.totalorder %v1041_v23, 7  ;;  %vm322_vm6 = vcmp.gt.s32.totalorder %v1041_v23, 6  ;;  %vm400_vm9 = vcmp.gt.s32.totalorder %v1041_v23, 5  ;;  %vm478_vm12 = vcmp.gt.s32.totalorder %v1041_v23, 4 }
  0x14   :  { %214 = vmatpush.bf16.msra.mxu1 %v1015_v4  ;;  %290 = vmatpush.bf16.msra.mxu2 %v1015_v4  ;;  %v255_v24 = vsel %vm242_vm1, 1, %v961_v0  ;;  %v334_v35 = vsel %vm322_vm6, 1, %v961_v0  ;;  %vm477_vm15 = vcmp.gt.s32.totalorder %v1041_v23, 3 }
  0x15   :  { %833 = vmatpush.bf16.msra.mxu3 %v828_v3 }
  0x17   :  { %215 = vmatmul.bf16.vlgmr.msra.gmra.mxu1 %v961_v0  ;;  %151 = vmatpush.bf16.msra.mxu0 %v827_v5 }
  0x18   :  { %445 = vmatpush.bf16.msrb.mxu1 %v1012_v2  ;;  %523 = vmatpush.bf16.msrb.mxu2 %v1012_v2 }
  0x19   :  { %834 = vmatpush.bf16.msra.mxu3 %v827_v5 }
  0x1b   :  { %152 = vmatpush.bf16.msra.mxu0 %v826_v6 }
  0x1c   :  { %446 = vmatpush.bf16.msrb.mxu1 %v1015_v4  ;;  %524 = vmatpush.bf16.msrb.mxu2 %v1015_v4 }
  0x1d   :  { %835 = vmatpush.bf16.msra.mxu3 %v826_v6 }
  0x1e   :  { %803 = vmatmul.msk.bf16.vlgmr.msra.gmra.mxu0 %vm132_vm0, %v822_v7 }
  0x20   :  { %655 = vmatpush.bf16.msra.mxu1 %v1012_v2  ;;  %806 = vmatmul.msk.bf16.vlgmr.msra.gmra.mxu3 %vm132_vm0, %v825_v51  ;;  %v824_v51 = vld [vmem:[#allocation3 + $0x10] sm:$0xff] }
  0x21   :  { %367 = vmatpush.bf16.msrb.mxu3 %v1012_v2 }
  0x24   :  { %656 = vmatpush.bf16.msra.mxu1 %v1015_v4 }
  0x25   :  { %368 = vmatpush.bf16.msrb.mxu3 %v1015_v4 }
  0x29   :  { %589 = vmatpush.bf16.msra.mxu3 %v1012_v2 }
  0x2d   :  { %590 = vmatpush.bf16.msra.mxu3 %v1015_v4 }
  0x2e   :  { %804 = vmatmul.msk.bf16.gmra.mxu0 %vm132_vm0, %v823_v52 }
  0x3e   :  { %805 = vmatmul.msk.bf16.gmra.mxu0 %vm132_vm0, %v824_v51 }
  0x94   :  { %v216_v8 = vpop.f32.mrf.mxu1 }
  0x9b   :  { %v154_v10 = vpop.f32.mrf.mxu0 }
  0x9c   :  { %v218_v11 = vpop.f32.mrf.mxu1  ;;  %v155_v12 = vadd.f32 %v1033_v9, %v154_v10 }
  0x9d   :  { %v412_v11 = vsel %vm400_vm9, 1, %v961_v0  ;;  %vm321_vm9 = vcmp.gt.s32.totalorder %v1041_v23, 1 }
  0x9e   :  { %v220_v13 = vadd.f32 %v216_v8, %v155_v12 }
  0xa0   :  { %848 = vtanh.f32 %v220_v13 }
  0xa3   :  { %v156_v36 = vpop.f32.mrf.mxu0  ;;  %v1089_v61 = vpop.f32.mrf.mxu3 }
  0xa4   :  { %v157_v37 = vadd.f32 %v1033_v9, %v156_v36 }
  0xa6   :  { %v849_v14 = vpop.eup %848 }
  0xa7   :  { %226 = vrot.lane.b32.xlu0 %v849_v14, %s957_s26  ;;  %v222_v15 = vmul.f32 0.5, %v849_v14 }
  0xa9   :  { %v223_v16 = vadd.f32 0.5, %v222_v15 }
  0xab   :  { %v224_v19 = vmul.f32 0.0, %v223_v16  ;;  %v1091_v62 = vpop.f32.mrf.mxu3  ;;  %v159_v63 = vpop.f32.mrf.mxu0 }
  0xac   :  { %v160_v1 = vadd.f32 %v1033_v9, %v159_v63 }
  0xb3   :  { %v161_v27 = vpop.f32.mrf.mxu0 }
 0x119   :  { %v227_v17 = vpop.permute.xlu0 %226 }
 0x11a   :  { %v229_v18 = vmul.f32 %v227_v17, %v223_v16 }
 0x11c   :  { %231 = vrot.lane.b32.xlu0 %v229_v18, %s962_s9 }
 0x18e   :  { %v232_v20 = vpop.permute.xlu0 %231 }
 0x18f   :  { %v234_v21 = vadd.f32 %v232_v20, %v224_v19 }
 0x191   :  { %850 = vtanh.f32 %v234_v21 }
 0x197   :  { %v851_v22 = vpop.eup %850 }
 0x198   :  { %237 = vrot.lane.b32.xlu1 %v851_v22, %s957_s26 }
 0x1a0   :  { %257 = vperm.xlu1 %844, %v255_v24  }
 0x20a   :  { %v238_v25 = vpop.permute.xlu1 %237 }
 0x20b   :  { %v1046_v26 = vmul.f32 %v238_v25, %v223_v16 }
 0x20d   :  { %269 = vrot.lane.b32.xlu2 %v1046_v26, %s962_s9 }
 0x212   :  { %v1053_v29 = vpop.permute.xlu1 %257 }
 0x213   :  { %vm259_vm3 = vcmp.eq.s32.totalorder %v1053_v29, 1 }
 0x214   :  { %vm267_vm4 = vmor %vm189_vm2, %vm259_vm3 }
 0x215   :  { %274 = vrot.lane.b32.xlu2 %v234_v21, %s963_s11 }
 0x267   :  { %v270_v30 = vpop.permute.xlu2 %269 }
 0x268   :  { %v272_v31 = vsel %vm267_vm4, %v270_v30, 0.0  ;;  %v162_v30 = vadd.f32 %v1033_v9, %v161_v27 }
 0x269   :  { %v279_v32 = vpack.c.bf16 %v272_v31, %v272_v31 }
 0x26b   :  { %815 = vmatmul.msk.bf16.vlgmr.msra.gmra.mxu2 %vm203_vm5, %v279_v32 }
 0x26c   :  { %721 = vmatpush.bf16.msra.mxu2 %v1012_v2 }
 0x26f   :  { %v275_v33 = vpop.permute.xlu2 %274 }
 0x270   :  { %v277_v34 = vsel %vm267_vm4, %v275_v33, 0.0  ;;  %722 = vmatpush.bf16.msra.mxu2 %v1015_v4  ;;  %vm399_vm4 = vcmp.gt.s32.totalorder %v1041_v23, 2 }
 0x271   :  { %301 = vrot.lane.b32.xlu1 %v277_v34, %s962_s9 }
 0x279   :  { %336 = vperm.xlu1 %844, %v334_v35   ;;  %v490_v35 = vsel %vm478_vm12, 1, %v961_v0 }
 0x2e3   :  { %v302_v46 = vpop.permute.xlu1 %301 }
 0x2eb   :  { %v1078_v55 = vpop.permute.xlu1 %336 }
 0x2ec   :  { %vm338_vm7 = vcmp.eq.s32.totalorder %v1078_v55, 1 }
 0x2ed   :  { %vm345_vm8 = vmor %vm189_vm2, %vm338_vm7 }
 0x2ee   :  { %v292_v38 = vpop.f32.mrf.mxu2 }
 0x2ef   :  { %v296_v39 = vadd.f32 %v292_v38, %v157_v37 }
 0x2f1   :  { %852 = vtanh.f32 %v296_v39 }
 0x2f6   :  { %v294_v40 = vpop.f32.mrf.mxu2 }
 0x2f7   :  { %v853_v41 = vpop.eup %852 }
 0x2f8   :  { %306 = vrot.lane.b32.xlu0 %v853_v41, %s957_s26  ;;  %v298_v42 = vmul.f32 0.5, %v853_v41 }
 0x2fa   :  { %v299_v43 = vadd.f32 0.5, %v298_v42 }
 0x2fc   :  { %v304_v47 = vmul.f32 %v302_v46, %v299_v43 }
 0x36a   :  { %v307_v44 = vpop.permute.xlu0 %306 }
 0x36b   :  { %v309_v45 = vmul.f32 %v307_v44, %v299_v43 }
 0x36d   :  { %311 = vrot.lane.b32.xlu2 %v309_v45, %s962_s9 }
 0x3c7   :  { %v312_v48 = vpop.permute.xlu2 %311 }
 0x3c8   :  { %v314_v49 = vadd.f32 %v312_v48, %v304_v47 }
 0x3ca   :  { %854 = vtanh.f32 %v314_v49 }
 0x3d0   :  { %v855_v50 = vpop.eup %854 }
 0x3d1   :  { %317 = vrot.lane.b32.xlu0 %v855_v50, %s957_s26  ;;  %v479_v50 = vsel %vm477_vm15, 1, %v961_v0  ;;  %vm253_vm15 = vcmask 130048  }
 0x3d9   :  { %352 = vrot.lane.b32.xlu0 %v314_v49, %s963_s11 }
 0x443   :  { %v318_v53 = vpop.permute.xlu0 %317 }
 0x444   :  { %v1076_v54 = vmul.f32 %v318_v53, %v299_v43 }
 0x446   :  { %347 = vrot.lane.b32.xlu2 %v1076_v54, %s962_s9 }
 0x44b   :  { %v353_v56 = vpop.permute.xlu0 %352 }
 0x44c   :  { %v355_v57 = vsel %vm345_vm8, %v353_v56, %v277_v34 }
 0x44e   :  { %379 = vrot.lane.b32.xlu2 %v355_v57, %s962_s9 }
 0x456   :  { %414 = vperm.xlu2 %845, %v412_v11  }
 0x4a0   :  { %v348_v58 = vpop.permute.xlu2 %347 }
 0x4a1   :  { %v350_v59 = vsel %vm345_vm8, %v348_v58, %v272_v31 }
 0x4a2   :  { %v357_v60 = vpack.c.bf16 %v350_v59, %v350_v59 }
 0x4a4   :  { %816 = vmatmul.msk.bf16.vlgmr.msrb.gmra.mxu3 %vm203_vm5, %v357_v60 }
 0x4a8   :  { %v380_v12 = vpop.permute.xlu2 %379 }
 0x4b0   :  { %v1102_v19 = vpop.permute.xlu2 %414 }
 0x4b1   :  { %vm416_vm10 = vcmp.eq.s32.totalorder %v1102_v19, 1 }
 0x4b2   :  { %vm423_vm11 = vmor %vm189_vm2, %vm416_vm10 }
 0x527   :  { %v370_v2 = vpop.f32.mrf.mxu3 }
 0x528   :  { %v374_v3 = vadd.f32 %v370_v2, %v160_v1 }
 0x52a   :  { %856 = vtanh.f32 %v374_v3 }
 0x52f   :  { %v372_v4 = vpop.f32.mrf.mxu3 }
 0x530   :  { %v857_v5 = vpop.eup %856 }
 0x531   :  { %384 = vrot.lane.b32.xlu1 %v857_v5, %s957_s26  ;;  %v376_v6 = vmul.f32 0.5, %v857_v5 }
 0x533   :  { %v377_v7 = vadd.f32 0.5, %v376_v6 }
 0x535   :  { %v382_v13 = vmul.f32 %v380_v12, %v377_v7 }
 0x5a3   :  { %v385_v8 = vpop.permute.xlu1 %384 }
 0x5a4   :  { %v387_v10 = vmul.f32 %v385_v8, %v377_v7 }
 0x5a6   :  { %389 = vrot.lane.b32.xlu0 %v387_v10, %s962_s9 }
 0x618   :  { %v390_v14 = vpop.permute.xlu0 %389 }
 0x619   :  { %v392_v15 = vadd.f32 %v390_v14, %v382_v13 }
 0x61b   :  { %858 = vtanh.f32 %v392_v15 }
 0x621   :  { %v859_v16 = vpop.eup %858 }
 0x622   :  { %395 = vrot.lane.b32.xlu1 %v859_v16, %s957_s26 }
 0x62a   :  { %430 = vrot.lane.b32.xlu1 %v392_v15, %s963_s11 }
 0x694   :  { %v396_v17 = vpop.permute.xlu1 %395 }
 0x695   :  { %v1100_v18 = vmul.f32 %v396_v17, %v377_v7  ;;  %v401_v17 = vsel %vm399_vm4, 1, %v961_v0 }
 0x697   :  { %425 = vrot.lane.b32.xlu0 %v1100_v18, %s962_s9 }
 0x69c   :  { %v431_v20 = vpop.permute.xlu1 %430 }
 0x69d   :  { %v433_v21 = vsel %vm423_vm11, %v431_v20, %v355_v57  ;;  %v164_v57 = vpop.f32.mrf.mxu0 }
 0x69e   :  { %v165_v58 = vadd.f32 %v1033_v9, %v164_v57 }
 0x69f   :  { %457 = vrot.lane.b32.xlu0 %v433_v21, %s962_s9 }
 0x6a7   :  { %492 = vperm.xlu0 %846, %v490_v35  }
 0x709   :  { %v426_v22 = vpop.permute.xlu0 %425 }
 0x70a   :  { %v428_v24 = vsel %vm423_vm11, %v426_v22, %v350_v59 }
 0x70b   :  { %v435_v25 = vpack.c.bf16 %v428_v24, %v428_v24 }
 0x70d   :  { %817 = vmatmul.msk.bf16.vlgmr.msrb.gmra.mxu1 %vm203_vm5, %v435_v25 }
 0x711   :  { %v458_v40 = vpop.permute.xlu0 %457 }
 0x719   :  { %v1122_v47 = vpop.permute.xlu0 %492 }
 0x71a   :  { %vm494_vm13 = vcmp.eq.s32.totalorder %v1122_v47, 1 }
 0x71b   :  { %vm501_vm14 = vmor %vm189_vm2, %vm494_vm13 }
 0x78a   :  { %v448_v31 = vpop.f32.mrf.mxu1 }
 0x78b   :  { %v452_v32 = vadd.f32 %v448_v31, %v162_v30 }
 0x78d   :  { %860 = vtanh.f32 %v452_v32 }
 0x792   :  { %v450_v33 = vpop.f32.mrf.mxu1 }
 0x793   :  { %v861_v34 = vpop.eup %860 }
 0x794   :  { %462 = vrot.lane.b32.xlu2 %v861_v34, %s957_s26  ;;  %v454_v36 = vmul.f32 0.5, %v861_v34 }
 0x796   :  { %v455_v37 = vadd.f32 0.5, %v454_v36 }
 0x798   :  { %v460_v41 = vmul.f32 %v458_v40, %v455_v37 }
 0x7ee   :  { %v463_v38 = vpop.permute.xlu2 %462 }
 0x7ef   :  { %v465_v39 = vmul.f32 %v463_v38, %v455_v37 }
 0x7f1   :  { %467 = vrot.lane.b32.xlu1 %v465_v39, %s962_s9 }
 0x863   :  { %v468_v42 = vpop.permute.xlu1 %467 }
 0x864   :  { %v470_v43 = vadd.f32 %v468_v42, %v460_v41 }
 0x866   :  { %862 = vtanh.f32 %v470_v43 }
 0x86c   :  { %v863_v44 = vpop.eup %862 }
 0x86d   :  { %473 = vrot.lane.b32.xlu2 %v863_v44, %s957_s26 }
 0x875   :  { %508 = vrot.lane.b32.xlu2 %v470_v43, %s963_s11 }
 0x8c7   :  { %v474_v45 = vpop.permute.xlu2 %473 }
 0x8c8   :  { %v1120_v46 = vmul.f32 %v474_v45, %v455_v37 }
 0x8ca   :  { %503 = vrot.lane.b32.xlu1 %v1120_v46, %s962_s9 }
 0x8cf   :  { %v509_v48 = vpop.permute.xlu2 %508 }
 0x8d0   :  { %v511_v49 = vsel %vm501_vm14, %v509_v48, %v433_v21 }
 0x8d1   :  { %535 = vrot.lane.b32.xlu2 %v511_v49, %s962_s9 }
 0x8d9   :  { %481 = vperm.xlu2 %845, %v479_v50  }
 0x92b   :  { %v536_v6 = vpop.permute.xlu2 %535 }
 0x933   :  { %v1143_v14 = vpop.permute.xlu2 %481 }
 0x934   :  { %vm483_vm0 = vcmp.eq.s32.totalorder %v1143_v14, 1 }
 0x935   :  { %vm567_vm1 = vmor %vm189_vm2, %vm483_vm0 }
 0x93c   :  { %v504_v52 = vpop.permute.xlu1 %503 }
 0x93d   :  { %v506_v53 = vsel %vm501_vm14, %v504_v52, %v428_v24  ;;  %v166_v24 = vpop.f32.mrf.mxu0  ;;  %vm265_vm14 = vcmask 261248  }
 0x93e   :  { %v513_v56 = vpack.c.bf16 %v506_v53, %v506_v53  ;;  %v167_v25 = vadd.f32 %v1033_v9, %v166_v24 }
 0x940   :  { %818 = vmatmul.msk.bf16.vlgmr.msrb.gmra.mxu2 %vm203_vm5, %v513_v56 }
 0x9c3   :  { %v526_v59 = vpop.f32.mrf.mxu2 }
 0x9c4   :  { %v530_v60 = vadd.f32 %v526_v59, %v165_v58 }
 0x9c6   :  { %864 = vtanh.f32 %v530_v60 }
 0x9cb   :  { %v528_v63 = vpop.f32.mrf.mxu2 }
 0x9cc   :  { %v865_v1 = vpop.eup %864 }
 0x9cd   :  { %540 = vrot.lane.b32.xlu1 %v865_v1, %s957_s26  ;;  %v532_v2 = vmul.f32 0.5, %v865_v1 }
 0x9cf   :  { %v533_v3 = vadd.f32 0.5, %v532_v2 }
 0x9d1   :  { %v538_v7 = vmul.f32 %v536_v6, %v533_v3 }
 0xa3f   :  { %v541_v4 = vpop.permute.xlu1 %540 }
 0xa40   :  { %v543_v5 = vmul.f32 %v541_v4, %v533_v3 }
 0xa42   :  { %545 = vrot.lane.b32.xlu0 %v543_v5, %s962_s9 }
 0xab4   :  { %v546_v8 = vpop.permute.xlu0 %545 }
 0xab5   :  { %v548_v10 = vadd.f32 %v546_v8, %v538_v7 }
 0xab7   :  { %866 = vtanh.f32 %v548_v10 }
 0xabd   :  { %v867_v11 = vpop.eup %866 }
 0xabe   :  { %551 = vrot.lane.b32.xlu1 %v867_v11, %s957_s26 }
 0xac6   :  { %574 = vrot.lane.b32.xlu1 %v548_v10, %s963_s11 }
 0xb30   :  { %v552_v12 = vpop.permute.xlu1 %551 }
 0xb31   :  { %v1141_v13 = vmul.f32 %v552_v12, %v533_v3 }
 0xb33   :  { %569 = vrot.lane.b32.xlu0 %v1141_v13, %s962_s9 }
 0xb38   :  { %v575_v15 = vpop.permute.xlu1 %574 }
 0xb39   :  { %v577_v16 = vsel %vm567_vm1, %v575_v15, %v511_v49  ;;  %v323_v49 = vsel %vm321_vm9, 1, %v961_v0 }
 0xb3b   :  { %601 = vrot.lane.b32.xlu0 %v577_v16, %s962_s9 }
 0xb43   :  { %403 = vperm.xlu0 %846, %v401_v17  }
 0xba5   :  { %v570_v20 = vpop.permute.xlu0 %569 }
 0xba6   :  { %v572_v21 = vsel %vm567_vm1, %v570_v20, %v506_v53  ;;  %v170_v53 = vadd.f32 %v1033_v9, %v1089_v61  ;;  %v172_v20 = vadd.f32 %v1033_v9, %v1091_v62  ;;  %v495_v62 = vsel %vm494_vm13, %v1120_v46, 0.0 }
 0xba7   :  { %v579_v22 = vpack.c.bf16 %v572_v21, %v572_v21 }
 0xba9   :  { %819 = vmatmul.msk.bf16.vlgmr.msra.gmra.mxu3 %vm203_vm5, %v579_v22 }
 0xbad   :  { %v602_v37 = vpop.permute.xlu0 %601 }
 0xbb5   :  { %v1163_v44 = vpop.permute.xlu0 %403 }
 0xbb6   :  { %vm405_vm6 = vcmp.eq.s32.totalorder %v1163_v44, 1 }
 0xbb7   :  { %vm633_vm8 = vmor %vm189_vm2, %vm405_vm6  ;;  %v406_v9 = vsel %vm405_vm6, %v1100_v18, 0.0 }
 0xc2c   :  { %v592_v27 = vpop.f32.mrf.mxu3 }
 0xc2d   :  { %v596_v30 = vadd.f32 %v592_v27, %v167_v25  ;;  %v260_v27 = vsel %vm259_vm3, %v1046_v26, 0.0 }
 0xc2f   :  { %868 = vtanh.f32 %v596_v30 }
 0xc34   :  { %v594_v31 = vpop.f32.mrf.mxu3 }
 0xc35   :  { %v869_v32 = vpop.eup %868 }
 0xc36   :  { %606 = vrot.lane.b32.xlu2 %v869_v32, %s957_s26  ;;  %v598_v33 = vmul.f32 0.5, %v869_v32 }
 0xc38   :  { %v599_v34 = vadd.f32 0.5, %v598_v33 }
 0xc3a   :  { %v604_v38 = vmul.f32 %v602_v37, %v599_v34  ;;  %v339_v37 = vsel %vm338_vm7, %v1076_v54, 0.0 }
 0xc90   :  { %v607_v35 = vpop.permute.xlu2 %606 }
 0xc91   :  { %v609_v36 = vmul.f32 %v607_v35, %v599_v34 }
 0xc93   :  { %611 = vrot.lane.b32.xlu1 %v609_v36, %s962_s9 }
 0xd05   :  { %v612_v39 = vpop.permute.xlu1 %611 }
 0xd06   :  { %v614_v40 = vadd.f32 %v612_v39, %v604_v38 }
 0xd08   :  { %870 = vtanh.f32 %v614_v40 }
 0xd0e   :  { %v871_v41 = vpop.eup %870 }
 0xd0f   :  { %617 = vrot.lane.b32.xlu2 %v871_v41, %s957_s26 }
 0xd17   :  { %640 = vrot.lane.b32.xlu2 %v614_v40, %s963_s11  ;;  %v561_v40 = vsel %vm483_vm0, %v1141_v13, 0.0 }
 0xd69   :  { %v618_v42 = vpop.permute.xlu2 %617 }
 0xd6a   :  { %v1161_v43 = vmul.f32 %v618_v42, %v599_v34 }
 0xd6c   :  { %635 = vrot.lane.b32.xlu1 %v1161_v43, %s962_s9 }
 0xd71   :  { %v641_v45 = vpop.permute.xlu2 %640 }
 0xd72   :  { %v643_v48 = vsel %vm633_vm8, %v641_v45, %v577_v16 }
 0xd74   :  { %667 = vrot.lane.b32.xlu1 %v643_v48, %s962_s9 }
 0xd7c   :  { %325 = vperm.xlu1 %844, %v323_v49  }
 0xdde   :  { %v636_v50 = vpop.permute.xlu1 %635 }
 0xddf   :  { %v638_v51 = vsel %vm633_vm8, %v636_v50, %v572_v21 }
 0xde0   :  { %v645_v52 = vpack.c.bf16 %v638_v51, %v638_v51 }
 0xde2   :  { %820 = vmatmul.msk.bf16.vlgmr.msra.gmra.mxu1 %vm203_vm5, %v645_v52  ;;  %v417_v52 = vsel %vm416_vm10, %v1100_v18, 0.0  ;;  %v627_v18 = vsel %vm405_vm6, %v1161_v43, 0.0 }
 0xde6   :  { %v668_v3 = vpop.permute.xlu1 %667 }
 0xdee   :  { %v1182_v10 = vpop.permute.xlu1 %325 }
 0xdef   :  { %vm327_vm11 = vcmp.eq.s32.totalorder %v1182_v10, 1 }
 0xdf0   :  { %vm699_vm12 = vmor %vm189_vm2, %vm327_vm11  ;;  %vm241_vm2 = vcmp.gt.s32.totalorder %v1041_v23, 0  ;;  %v328_v55 = vsel %vm327_vm11, %v1076_v54, 0.0  ;;  %v555_v54 = vsel %vm494_vm13, %v1141_v13, 0.0 }
 0xdf1   :  { %v243_v28 = vsel %vm241_vm2, 1, %v961_v0  ;;  %v621_v0 = vsel %vm416_vm10, %v1161_v43, 0.0 }
 0xe5f   :  { %v658_v56 = vpop.f32.mrf.mxu1 }
 0xe60   :  { %v662_v57 = vadd.f32 %v658_v56, %v170_v53 }
 0xe62   :  { %872 = vtanh.f32 %v662_v57 }
 0xe67   :  { %v660_v58 = vpop.f32.mrf.mxu1 }
 0xe68   :  { %v873_v59 = vpop.eup %872 }
 0xe69   :  { %672 = vrot.lane.b32.xlu0 %v873_v59, %s957_s26  ;;  %v664_v60 = vmul.f32 0.5, %v873_v59 }
 0xe6b   :  { %v665_v63 = vadd.f32 0.5, %v664_v60 }
 0xe6d   :  { %v670_v4 = vmul.f32 %v668_v3, %v665_v63 }
 0xedb   :  { %v673_v1 = vpop.permute.xlu0 %672 }
 0xedc   :  { %v675_v2 = vmul.f32 %v673_v1, %v665_v63 }
 0xede   :  { %677 = vrot.lane.b32.xlu2 %v675_v2, %s962_s9 }
 0xf38   :  { %v678_v5 = vpop.permute.xlu2 %677 }
 0xf39   :  { %v680_v6 = vadd.f32 %v678_v5, %v670_v4 }
 0xf3b   :  { %874 = vtanh.f32 %v680_v6 }
 0xf41   :  { %v875_v7 = vpop.eup %874 }
 0xf42   :  { %683 = vrot.lane.b32.xlu0 %v875_v7, %s957_s26 }
 0xf4a   :  { %706 = vrot.lane.b32.xlu0 %v680_v6, %s963_s11 }
 0xfb4   :  { %v684_v61 = vpop.permute.xlu0 %683 }
 0xfb5   :  { %v686_v8 = vmul.f32 %v684_v61, %v665_v63 }
 0xfb7   :  { %701 = vrot.lane.b32.xlu2 %v686_v8, %s962_s9  ;;  %v693_v23 = vsel %vm327_vm11, %v686_v8, 0.0  ;;  %v687_v41 = vsel %vm338_vm7, %v686_v8, 0.0 }
 0xfbc   :  { %v707_v11 = vpop.permute.xlu0 %706 }
 0xfbd   :  { %v709_v12 = vsel %vm699_vm12, %v707_v11, %v643_v48 }
 0xfbf   :  { %733 = vrot.lane.b32.xlu2 %v709_v12, %s962_s9 }
0x1011   :  { %v702_v15 = vpop.permute.xlu2 %701 }
0x1012   :  { %v704_v16 = vsel %vm699_vm12, %v702_v15, %v638_v51 }
0x1013   :  { %v711_v17 = vpack.c.bf16 %v704_v16, %v704_v16 }
0x1015   :  { %821 = vmatmul.msk.bf16.vlgmr.msra.gmra.mxu2 %vm203_vm5, %v711_v17 }
0x1098   :  { %v724_v21 = vpop.f32.mrf.mxu2 }
0x1099   :  { %v728_v22 = vadd.f32 %v724_v21, %v172_v20 }
0x109b   :  { %876 = vtanh.f32 %v728_v22 }
0x10a0   :  { %v726_v24 = vpop.f32.mrf.mxu2 }
0x10a1   :  { %v877_v25 = vpop.eup %876 }
0x10a2   :  { %738 = vrot.lane.b32.xlu1 %v877_v25, %s957_s26  ;;  %v730_v30 = vmul.f32 0.5, %v877_v25 }
0x10a4   :  { %v731_v31 = vadd.f32 0.5, %v730_v30 }
0x10aa   :  { %245 = vperm.xlu1 %844, %v243_v28  }
0x10b2   :  { %262 = vrot.lane.b32.xlu1 %v260_v27, %s962_s9 }
0x10ba   :  { %408 = vrot.lane.b32.xlu1 %v406_v9, %s962_s9 }
0x10c2   :  { %497 = vrot.lane.b32.xlu1 %v495_v62, %s962_s9 }
0x10ca   :  { %623 = vrot.lane.b32.xlu1 %v621_v0, %s962_s9 }
0x10d2   :  { %695 = vrot.lane.b32.xlu1 %v693_v23, %s962_s9 }
0x1114   :  { %v739_v32 = vpop.permute.xlu1 %738 }
0x1115   :  { %v741_v33 = vmul.f32 %v739_v32, %v731_v31 }
0x1117   :  { %743 = vrot.lane.b32.xlu0 %v741_v33, %s962_s9 }
0x111c   :  { %v246_v34 = vpop.permute.xlu1 %245 }
0x111d   :  { %vm247_vm5 = vcmp.eq.s32.totalorder %v246_v34, 1 }
0x111e   :  { %v248_v35 = vsel %vm247_vm5, %v1046_v26, 0.0  ;;  %v484_v26 = vsel %vm483_vm0, %v1120_v46, 0.0  ;;  %v734_v46 = vpop.permute.xlu2 %733 }
0x111f   :  { %250 = vrot.lane.b32.xlu0 %v248_v35, %s962_s9  ;;  %v736_v42 = vmul.f32 %v734_v46, %v731_v31 }
0x1124   :  { %v263_v36 = vpop.permute.xlu1 %262 }
0x1125   :  { %266 = vst.msk [vmem:[%s1326_s5 + $0x38] sm:$0xff] %vm265_vm14, %v263_v36 }
0x1127   :  { %341 = vrot.lane.b32.xlu0 %v339_v37, %s962_s9 }
0x112c   :  { %v409_v38 = vpop.permute.xlu1 %408 }
0x112d   :  { %411 = vst.msk [vmem:[%s1326_s5 + $0x10] sm:$0xff] %vm253_vm15, %v409_v38 }
0x112f   :  { %486 = vrot.lane.b32.xlu0 %v484_v26, %s962_s9 }
0x1134   :  { %v498_v39 = vpop.permute.xlu1 %497 }
0x1135   :  { %500 = vst.msk [vmem:[%s1326_s5 + $0x20] sm:$0xff] %vm265_vm14, %v498_v39 }
0x1137   :  { %563 = vrot.lane.b32.xlu0 %v561_v40, %s962_s9 }
0x113c   :  { %v624_v19 = vpop.permute.xlu1 %623 }
0x113f   :  { %689 = vrot.lane.b32.xlu0 %v687_v41, %s962_s9 }
0x1144   :  { %v696_v60 = vpop.permute.xlu1 %695 }
0x1189   :  { %v744_v45 = vpop.permute.xlu0 %743 }
0x118a   :  { %v746_v48 = vadd.f32 %v744_v45, %v736_v42 }
0x118c   :  { %878 = vtanh.f32 %v746_v48 }
0x1191   :  { %v251_v49 = vpop.permute.xlu0 %250 }
0x1192   :  { %v879_v50 = vpop.eup %878  ;;  %254 = vst.msk [vmem:[%s1326_s5] sm:$0xff] %vm253_vm15, %v251_v49 }
0x1193   :  { %749 = vrot.lane.b32.xlu2 %v879_v50, %s957_s26 }
0x1199   :  { %v342_v14 = vpop.permute.xlu0 %341 }
0x119a   :  { %344 = vst.msk [vmem:[%s1326_s5 + $0x30] sm:$0xff] %vm265_vm14, %v342_v14 }
0x119b   :  { %330 = vrot.lane.b32.xlu2 %v328_v55, %s962_s9 }
0x11a1   :  { %v487_v51 = vpop.permute.xlu0 %486 }
0x11a2   :  { %489 = vst.msk [vmem:[%s1326_s5 + $0x18] sm:$0xff] %vm253_vm15, %v487_v51 }
0x11a3   :  { %419 = vrot.lane.b32.xlu2 %v417_v52, %s962_s9 }
0x11a9   :  { %v564_v53 = vpop.permute.xlu0 %563 }
0x11aa   :  { %566 = vst.msk [vmem:[%s1326_s5 + $0x18] sm:$0xff] %vm265_vm14, %v564_v53 }
0x11ab   :  { %557 = vrot.lane.b32.xlu2 %v555_v54, %s962_s9 }
0x11b1   :  { %v690_v56 = vpop.permute.xlu0 %689 }
0x11b2   :  { %692 = vst.msk [vmem:[%s1326_s5 + $0x30] sm:$0xff] %vm253_vm15, %v690_v56 }
0x11b3   :  { %629 = vrot.lane.b32.xlu2 %v627_v18, %s962_s9 }
0x11ed   :  { %v750_v57 = vpop.permute.xlu2 %749 }
0x11ee   :  { %v752_v58 = vmul.f32 %v750_v57, %v731_v31 }
0x11f0   :  { %v759_v47 = vsel %vm247_vm5, %v752_v58, 0.0  ;;  %v753_v13 = vsel %vm259_vm3, %v752_v58, 0.0 }
0x11f1   :  { %761 = vrot.lane.b32.xlu0 %v759_v47, %s962_s9  ;;  %755 = vrot.lane.b32.xlu2 %v753_v13, %s962_s9 }
0x11f5   :  { %v331_v59 = vpop.permute.xlu2 %330 }
0x11f6   :  { %333 = vst.msk [vmem:[%s1326_s5 + $0x8] sm:$0xff] %vm253_vm15, %v331_v59 }
0x11f7   :  { %698 = vst.msk [vmem:[%s1326_s5 + $0x8] sm:$0xff] %vm265_vm14, %v696_v60 }
0x11fd   :  { %v420_v43 = vpop.permute.xlu2 %419 }
0x11fe   :  { %422 = vst.msk [vmem:[%s1326_s5 + $0x28] sm:$0xff] %vm265_vm14, %v420_v43 }
0x11ff   :  { %626 = vst.msk [vmem:[%s1326_s5 + $0x28] sm:$0xff] %vm253_vm15, %v624_v19 }
0x1205   :  { %v558_v29 = vpop.permute.xlu2 %557 }
0x1206   :  { %560 = vst.msk [vmem:[%s1326_s5 + $0x20] sm:$0xff] %vm253_vm15, %v558_v29 }
0x120d   :  { %v630_v44 = vpop.permute.xlu2 %629 }
0x120e   :  { %632 = vst.msk [vmem:[%s1326_s5 + $0x10] sm:$0xff] %vm265_vm14, %v630_v44 }
0x124b   :  { %v756_v63 = vpop.permute.xlu2 %755 }
0x124c   :  { %758 = vst.msk [vmem:[%s1326_s5 + $0x38] sm:$0xff] %vm253_vm15, %v756_v63 }
0x1263   :  { %v762_v1 = vpop.permute.xlu0 %761 }
0x1264   :  { %764 = vst.msk [vmem:[%s1326_s5] sm:$0xff] %vm265_vm14, %v762_v1 }
0x1265   :  { %769 = vsyncpa [#allocation4], 1 }
0x1266   :  { %770 = vsyncpa [#allocation6], 1 }

</bundles_post_ra>
